<compile_context>
chip_gen: v6e
topology: v6e:2x2x1
jax: 0.10.0
libtpu: 0.0.40
codegen_flags: <defaults>
</compile_context>

<pallas_src>
import functools

import jax
import jax.numpy as jnp
from jax import lax
from jax.experimental import pallas as pl
from jax.experimental.pallas import tpu as pltpu


# ----------------------------------------------------------------------------
# Pallas kernel
# ----------------------------------------------------------------------------
def _make_kernel(num_layers, seq_len, batch, hidden_dim):
    L, T, B, H = num_layers, seq_len, batch, hidden_dim

    def kernel(*refs):
        # ---- unpack refs ----------------------------------------------------
        x_ref = refs[0]                                   # (T*B, E)   f32 VMEM
        idx = 1
        lstm_refs = []
        for _ in range(L):
            # (in_dim, 4H) bf16, (H, 4H) bf16, (1, 4H) f32   (gate order i|f|o|g)
            lstm_refs.append((refs[idx], refs[idx + 1], refs[idx + 2]))
            idx += 3
        combw_ref = refs[idx + 0]                         # (L,)        f32 SMEM
        combb_ref = refs[idx + 1]                         # (1,)        f32 SMEM
        fc1w_ref = refs[idx + 2]                          # (H, last)   bf16 VMEM
        fc1b_ref = refs[idx + 3]                          # (1, last)   f32 VMEM
        outw_ref = refs[idx + 4]                          # (1, last)   f32 VMEM
        outb_ref = refs[idx + 5]                          # (1,)        f32 SMEM
        hs_ref = refs[idx + 6]                            # (T*B, H)    f32 out
        probs_ref = refs[idx + 7]                         # (B, 1)      f32 out
        hbuf = refs[idx + 8]                              # (T*B, H)    f32 scratch

        inp = x_ref[...]                                  # (T*B, in_dim) f32
        combined = jnp.zeros((T * B, H), jnp.float32)

        for l in range(L):
            wihT_ref, whhT_ref, b_ref = lstm_refs[l]
            # Hoisted loop-invariant loads.
            wihT = wihT_ref[...]                          # (in_dim, 4H) bf16
            whhT = whhT_ref[...]                          # (H, 4H)      bf16
            bias = b_ref[...]                             # (1, 4H)      f32

            # Input projection hoisted out of the recurrence: one MXU matmul
            # over all T timesteps at once.
            gates_x = jnp.dot(inp.astype(jnp.bfloat16), wihT,
                              preferred_element_type=jnp.float32) + bias

            h = jnp.zeros((B, H), jnp.float32)
            c = jnp.zeros((B, H), jnp.float32)

            # Fully unrolled (T static) recurrence: only h @ W_hh^T per step.
            for t in range(T):
                g = gates_x[t * B:(t + 1) * B, :] + jnp.dot(
                    h.astype(jnp.bfloat16), whhT,
                    preferred_element_type=jnp.float32)
                # Gates were reordered at pack time to [i | f | o | g]:
                # one contiguous sigmoid over 3H lanes + one tanh over H lanes.
                sig = jax.nn.sigmoid(g[:, :3 * H])
                i_g = sig[:, 0 * H:1 * H]
                f_g = sig[:, 1 * H:2 * H]
                o_g = sig[:, 2 * H:3 * H]
                g_g = jnp.tanh(g[:, 3 * H:4 * H])
                c = f_g * c + i_g * g_g
                h = o_g * jnp.tanh(c)
                hbuf[t * B:(t + 1) * B, :] = h

            layer_out = hbuf[...]                         # (T*B, H) f32
            combined = combined + layer_out * combw_ref[l]
            inp = layer_out

        # ELMo linear combination bias + bulk store of hidden states.
        combined = combined + combb_ref[0]
        hs_ref[...] = combined

        # Max-pool over time: running max over the T groups of B rows (unrolled).
        mp = combined[0:B, :]
        for t in range(1, T):
            mp = jnp.maximum(mp, combined[t * B:(t + 1) * B, :])

        # fc1 + ReLU + out + sigmoid head.
        fc1 = jnp.maximum(
            jnp.dot(mp.astype(jnp.bfloat16), fc1w_ref[...],
                    preferred_element_type=jnp.float32) + fc1b_ref[...], 0.0)
        logits = jnp.sum(fc1 * outw_ref[...], axis=-1, keepdims=True) + outb_ref[0]
        probs_ref[...] = jax.nn.sigmoid(logits)

    return kernel


# ----------------------------------------------------------------------------
# Parameter packing (gate reorder [i,f,g,o] -> [i,f,o,g], transpose, bf16 cast)
# ----------------------------------------------------------------------------
def _pack_lstm_params(w_ih, w_hh, b_ih, b_hh, H):
    def reorder_rows(m):
        # PyTorch gate row order [i; f; g; o]  ->  [i; f; o; g]
        return jnp.concatenate([m[:2 * H], m[3 * H:4 * H], m[2 * H:3 * H]], axis=0)

    wihT = reorder_rows(w_ih).T.astype(jnp.bfloat16)                 # (in_dim, 4H)
    whhT = reorder_rows(w_hh).T.astype(jnp.bfloat16)                 # (H, 4H)
    bias = reorder_rows(b_ih + b_hh)[None, :].astype(jnp.float32)    # (1, 4H)
    return wihT, whhT, bias


# ----------------------------------------------------------------------------
# Wrapper (layout plumbing only)
# ----------------------------------------------------------------------------
@functools.partial(jax.jit, static_argnames=("num_layers", "hidden_dim", "last_hid"))
def elmo_classifier_forward(x, params, *, num_layers, hidden_dim, last_hid):
    B, T, E = x.shape
    H = hidden_dim
    L = num_layers

    vm = pl.BlockSpec(memory_space=pltpu.MemorySpace.VMEM)
    sm = pl.BlockSpec(memory_space=pltpu.MemorySpace.SMEM)

    # Time-major, flattened to (T*B, E) so per-layer input projection is one matmul.
    x_flat = jnp.transpose(x, (1, 0, 2)).reshape(T * B, E).astype(jnp.float32)

    inputs = [x_flat]
    in_specs = [vm]
    for l in range(L):
        w_ih, w_hh, b_ih, b_hh = params["lstm"][l]
        wihT, whhT, bias = _pack_lstm_params(w_ih, w_hh, b_ih, b_hh, H)
        inputs += [wihT, whhT, bias]
        in_specs += [vm, vm, vm]
    inputs += [
        params["comb_w"][0].astype(jnp.float32),          # (L,)
        params["comb_b"].astype(jnp.float32),             # (1,)
        params["fc1_w"].T.astype(jnp.bfloat16),           # (H, last_hid)
        params["fc1_b"][None, :].astype(jnp.float32),     # (1, last_hid)
        params["out_w"].astype(jnp.float32),              # (1, last_hid)
        params["out_b"].astype(jnp.float32),              # (1,)
    ]
    in_specs += [sm, sm, vm, vm, vm, sm]

    hs_flat, probs = pl.pallas_call(
        _make_kernel(L, T, B, H),
        out_shape=(
            jax.ShapeDtypeStruct((T * B, H), jnp.float32),   # hidden states (time-major, flat)
            jax.ShapeDtypeStruct((B, 1), jnp.float32),       # sigmoid(out)
        ),
        in_specs=in_specs,
        out_specs=(vm, vm),
        scratch_shapes=[pltpu.VMEM((T * B, H), jnp.float32)],
        compiler_params=pltpu.CompilerParams(vmem_limit_bytes=32 * 1024 * 1024),
    )(*inputs)

    hidden_states = jnp.transpose(hs_flat.reshape(T, B, H), (1, 0, 2))  # (B, T, H)
    return probs, hidden_states


# ----------------------------------------------------------------------------
# Pure-JAX reference (mirrors the PyTorch forward exactly, original gate order)
# ----------------------------------------------------------------------------
def reference_forward(x, params, *, num_layers, hidden_dim):
    B, T, E = x.shape
    H = hidden_dim
    hidden = x
    layer_outputs = []
    for l in range(num_layers):
        w_ih, w_hh, b_ih, b_hh = params["lstm"][l]

        def step(carry, x_t, w_ih=w_ih, w_hh=w_hh, b_ih=b_ih, b_hh=b_hh):
            h, c = carry
            gates = x_t @ w_ih.T + b_ih + h @ w_hh.T + b_hh
            i_g, f_g, g_g, o_g = jnp.split(gates, 4, axis=-1)
            i_g = jax.nn.sigmoid(i_g)
            f_g = jax.nn.sigmoid(f_g)
            g_g = jnp.tanh(g_g)
            o_g = jax.nn.sigmoid(o_g)
            c = f_g * c + i_g * g_g
            h = o_g * jnp.tanh(c)
            return (h, c), h

        init = (jnp.zeros((B, H), jnp.float32), jnp.zeros((B, H), jnp.float32))
        _, hseq = lax.scan(step, init, jnp.transpose(hidden, (1, 0, 2)))
        hidden = jnp.transpose(hseq, (1, 0, 2))
        layer_outputs.append(hidden)

    stacked = jnp.stack(layer_outputs, axis=-1)              # (B, T, H, L)
    combined = jnp.einsum("bthl,l->bth", stacked, params["comb_w"][0]) + params["comb_b"][0]
    max_pooled = jnp.max(combined, axis=1)                   # (B, H)
    fc1 = jnp.maximum(max_pooled @ params["fc1_w"].T + params["fc1_b"], 0.0)
    logits = fc1 @ params["out_w"].T + params["out_b"]
    return jax.nn.sigmoid(logits), combined


# ----------------------------------------------------------------------------
# Main
# ----------------------------------------------------------------------------
if __name__ == "__main__":
    B, T, E, H, L, LAST_HID = 2, 8, 32, 32, 2, 16

    key = jax.random.PRNGKey(0)

    def uni(key, shape, scale=0.2):
        return jax.random.uniform(key, shape, jnp.float32, -scale, scale)

    keys = jax.random.split(key, 32)
    ki = iter(keys)

    # Deterministic synthetic parameters (stands in for torch.load'd LM weights).
    params = {"lstm": []}
    for l in range(L):
        in_dim = E if l == 0 else H
        params["lstm"].append((
            uni(next(ki), (4 * H, in_dim)),   # weight_ih_l0
            uni(next(ki), (4 * H, H)),        # weight_hh_l0
            uni(next(ki), (4 * H,)),          # bias_ih_l0
            uni(next(ki), (4 * H,)),          # bias_hh_l0
        ))
    params["comb_w"] = uni(next(ki), (1, L))          # linear_comb.weight
    params["comb_b"] = uni(next(ki), (1,))            # linear_comb.bias
    params["fc1_w"] = uni(next(ki), (LAST_HID, H))    # fc1.weight
    params["fc1_b"] = uni(next(ki), (LAST_HID,))      # fc1.bias
    params["out_w"] = uni(next(ki), (1, LAST_HID))    # out.weight
    params["out_b"] = uni(next(ki), (1,))             # out.bias

    x = uni(next(ki), (B, T, E), scale=1.0)

    probs, hidden_states = elmo_classifier_forward(
        x, params, num_layers=L, hidden_dim=H, last_hid=LAST_HID)
    probs = jax.block_until_ready(probs)
    hidden_states = jax.block_until_ready(hidden_states)

    ref_probs, ref_hidden = reference_forward(x, params, num_layers=L, hidden_dim=H)

    assert probs.shape == (B, 1), probs.shape
    assert hidden_states.shape == (B, T, H), hidden_states.shape
    assert jnp.allclose(probs, ref_probs, atol=2e-2, rtol=2e-2)
    assert jnp.allclose(hidden_states, ref_hidden, atol=2e-2, rtol=2e-2)

    print("KERNEL_OK")
</pallas_src>

<mosaic_0001>
module attributes {stable_mosaic.version = 11 : i64} {
  func.func @kernel(%arg0: memref<16x32xf32, #tpu.memory_space<vmem>>, %arg1: memref<32x128xbf16, #tpu.memory_space<vmem>>, %arg2: memref<32x128xbf16, #tpu.memory_space<vmem>>, %arg3: memref<1x128xf32, #tpu.memory_space<vmem>>, %arg4: memref<32x128xbf16, #tpu.memory_space<vmem>>, %arg5: memref<32x128xbf16, #tpu.memory_space<vmem>>, %arg6: memref<1x128xf32, #tpu.memory_space<vmem>>, %arg7: memref<2xf32, #tpu.memory_space<smem>>, %arg8: memref<1xf32, #tpu.memory_space<smem>>, %arg9: memref<32x16xbf16, #tpu.memory_space<vmem>>, %arg10: memref<1x16xf32, #tpu.memory_space<vmem>>, %arg11: memref<1x16xf32, #tpu.memory_space<vmem>>, %arg12: memref<1xf32, #tpu.memory_space<smem>>, %arg13: memref<16x32xf32, #tpu.memory_space<vmem>>, %arg14: memref<2x1xf32, #tpu.memory_space<vmem>>, %arg15: memref<16x32xf32, #tpu.memory_space<vmem>>) attributes {dimension_semantics = [], scalar_prefetch = 0 : i64, scratch_operands = 1 : i64, tpu.core_type = #tpu.core_type<tc>} {
    %c0 = arith.constant 0 : index
    %c0_0 = arith.constant 0 : index
    %0 = vector.load %arg0[%c0, %c0_0] : memref<16x32xf32, #tpu.memory_space<vmem>>, vector<16x32xf32>
    %cst = arith.constant 0.000000e+00 : f32
    %1 = vector.broadcast %cst : f32 to vector<16x32xf32>
    %c0_1 = arith.constant 0 : index
    %c0_2 = arith.constant 0 : index
    %2 = vector.load %arg1[%c0_1, %c0_2] : memref<32x128xbf16, #tpu.memory_space<vmem>>, vector<32x128xbf16>
    %c0_3 = arith.constant 0 : index
    %c0_4 = arith.constant 0 : index
    %3 = vector.load %arg2[%c0_3, %c0_4] : memref<32x128xbf16, #tpu.memory_space<vmem>>, vector<32x128xbf16>
    %c0_5 = arith.constant 0 : index
    %c0_6 = arith.constant 0 : index
    %4 = vector.load %arg3[%c0_5, %c0_6] : memref<1x128xf32, #tpu.memory_space<vmem>>, vector<1x128xf32>
    %5 = arith.truncf %0 : vector<16x32xf32> to vector<16x32xbf16>
    %cst_7 = arith.constant dense<0.000000e+00> : vector<16x128xf32>
    %6 = tpu.matmul %5, %2, %cst_7 {dimension_numbers = #tpu.dot_dimension_numbers<[1], [0], [0], [1], [0, 0, 1, 1], [], []>} : vector<16x32xbf16>, vector<32x128xbf16>, vector<16x128xf32> -> vector<16x128xf32>
    %7 = vector.broadcast %4 : vector<1x128xf32> to vector<16x128xf32>
    %8 = arith.addf %6, %7 : vector<16x128xf32>
    %cst_8 = arith.constant 0.000000e+00 : f32
    %9 = vector.broadcast %cst_8 : f32 to vector<2x32xf32>
    %cst_9 = arith.constant 0.000000e+00 : f32
    %10 = vector.broadcast %cst_9 : f32 to vector<2x32xf32>
    %11 = vector.extract_strided_slice %8 {offsets = [0, 0], sizes = [2, 128], strides = [1, 1]} : vector<16x128xf32> to vector<2x128xf32>
    %12 = arith.truncf %9 : vector<2x32xf32> to vector<2x32xbf16>
    %cst_10 = arith.constant dense<0.000000e+00> : vector<2x128xf32>
    %13 = tpu.matmul %12, %3, %cst_10 {dimension_numbers = #tpu.dot_dimension_numbers<[1], [0], [0], [1], [0, 0, 1, 1], [], []>} : vector<2x32xbf16>, vector<32x128xbf16>, vector<2x128xf32> -> vector<2x128xf32>
    %14 = arith.addf %11, %13 : vector<2x128xf32>
    %15 = vector.extract_strided_slice %14 {offsets = [0, 0], sizes = [2, 96], strides = [1, 1]} : vector<2x128xf32> to vector<2x96xf32>
    %16 = arith.negf %15 : vector<2x96xf32>
    %17 = math.exp %16 : vector<2x96xf32>
    %cst_11 = arith.constant 1.000000e+00 : f32
    %18 = vector.broadcast %cst_11 : f32 to vector<2x96xf32>
    %19 = arith.addf %18, %17 : vector<2x96xf32>
    %20 = arith.divf %18, %19 : vector<2x96xf32>
    %21 = vector.extract_strided_slice %20 {offsets = [0, 0], sizes = [2, 32], strides = [1, 1]} : vector<2x96xf32> to vector<2x32xf32>
    %22 = vector.extract_strided_slice %20 {offsets = [0, 32], sizes = [2, 32], strides = [1, 1]} : vector<2x96xf32> to vector<2x32xf32>
    %23 = vector.extract_strided_slice %20 {offsets = [0, 64], sizes = [2, 32], strides = [1, 1]} : vector<2x96xf32> to vector<2x32xf32>
    %24 = vector.extract_strided_slice %14 {offsets = [0, 96], sizes = [2, 32], strides = [1, 1]} : vector<2x128xf32> to vector<2x32xf32>
    %25 = math.tanh %24 : vector<2x32xf32>
    %26 = arith.mulf %22, %10 : vector<2x32xf32>
    %27 = arith.mulf %21, %25 : vector<2x32xf32>
    %28 = arith.addf %26, %27 : vector<2x32xf32>
    %29 = math.tanh %28 : vector<2x32xf32>
    %30 = arith.mulf %23, %29 : vector<2x32xf32>
    %c0_12 = arith.constant 0 : index
    %c0_13 = arith.constant 0 : index
    %31 = vector.load %arg15[%c0_12, %c0_13] : memref<16x32xf32, #tpu.memory_space<vmem>>, vector<2x32xf32>
    tpu.vector_store %arg15[%c0_12, %c0_13], %30 {strides = array<i32>} : memref<16x32xf32, #tpu.memory_space<vmem>>, vector<2x32xf32>,
    %32 = vector.extract_strided_slice %8 {offsets = [2, 0], sizes = [2, 128], strides = [1, 1]} : vector<16x128xf32> to vector<2x128xf32>
    %33 = arith.truncf %30 : vector<2x32xf32> to vector<2x32xbf16>
    %cst_14 = arith.constant dense<0.000000e+00> : vector<2x128xf32>
    %34 = tpu.matmul %33, %3, %cst_14 {dimension_numbers = #tpu.dot_dimension_numbers<[1], [0], [0], [1], [0, 0, 1, 1], [], []>} : vector<2x32xbf16>, vector<32x128xbf16>, vector<2x128xf32> -> vector<2x128xf32>
    %35 = arith.addf %32, %34 : vector<2x128xf32>
    %36 = vector.extract_strided_slice %35 {offsets = [0, 0], sizes = [2, 96], strides = [1, 1]} : vector<2x128xf32> to vector<2x96xf32>
    %37 = arith.negf %36 : vector<2x96xf32>
    %38 = math.exp %37 : vector<2x96xf32>
    %cst_15 = arith.constant 1.000000e+00 : f32
    %39 = vector.broadcast %cst_15 : f32 to vector<2x96xf32>
    %40 = arith.addf %39, %38 : vector<2x96xf32>
    %41 = arith.divf %39, %40 : vector<2x96xf32>
    %42 = vector.extract_strided_slice %41 {offsets = [0, 0], sizes = [2, 32], strides = [1, 1]} : vector<2x96xf32> to vector<2x32xf32>
    %43 = vector.extract_strided_slice %41 {offsets = [0, 32], sizes = [2, 32], strides = [1, 1]} : vector<2x96xf32> to vector<2x32xf32>
    %44 = vector.extract_strided_slice %41 {offsets = [0, 64], sizes = [2, 32], strides = [1, 1]} : vector<2x96xf32> to vector<2x32xf32>
    %45 = vector.extract_strided_slice %35 {offsets = [0, 96], sizes = [2, 32], strides = [1, 1]} : vector<2x128xf32> to vector<2x32xf32>
    %46 = math.tanh %45 : vector<2x32xf32>
    %47 = arith.mulf %43, %28 : vector<2x32xf32>
    %48 = arith.mulf %42, %46 : vector<2x32xf32>
    %49 = arith.addf %47, %48 : vector<2x32xf32>
    %50 = math.tanh %49 : vector<2x32xf32>
    %51 = arith.mulf %44, %50 : vector<2x32xf32>
    %c2 = arith.constant 2 : index
    %c0_16 = arith.constant 0 : index
    %52 = vector.load %arg15[%c2, %c0_16] : memref<16x32xf32, #tpu.memory_space<vmem>>, vector<2x32xf32>
    tpu.vector_store %arg15[%c2, %c0_16], %51 {strides = array<i32>} : memref<16x32xf32, #tpu.memory_space<vmem>>, vector<2x32xf32>,
    %53 = vector.extract_strided_slice %8 {offsets = [4, 0], sizes = [2, 128], strides = [1, 1]} : vector<16x128xf32> to vector<2x128xf32>
    %54 = arith.truncf %51 : vector<2x32xf32> to vector<2x32xbf16>
    %cst_17 = arith.constant dense<0.000000e+00> : vector<2x128xf32>
    %55 = tpu.matmul %54, %3, %cst_17 {dimension_numbers = #tpu.dot_dimension_numbers<[1], [0], [0], [1], [0, 0, 1, 1], [], []>} : vector<2x32xbf16>, vector<32x128xbf16>, vector<2x128xf32> -> vector<2x128xf32>
    %56 = arith.addf %53, %55 : vector<2x128xf32>
    %57 = vector.extract_strided_slice %56 {offsets = [0, 0], sizes = [2, 96], strides = [1, 1]} : vector<2x128xf32> to vector<2x96xf32>
    %58 = arith.negf %57 : vector<2x96xf32>
    %59 = math.exp %58 : vector<2x96xf32>
    %cst_18 = arith.constant 1.000000e+00 : f32
    %60 = vector.broadcast %cst_18 : f32 to vector<2x96xf32>
    %61 = arith.addf %60, %59 : vector<2x96xf32>
    %62 = arith.divf %60, %61 : vector<2x96xf32>
    %63 = vector.extract_strided_slice %62 {offsets = [0, 0], sizes = [2, 32], strides = [1, 1]} : vector<2x96xf32> to vector<2x32xf32>
    %64 = vector.extract_strided_slice %62 {offsets = [0, 32], sizes = [2, 32], strides = [1, 1]} : vector<2x96xf32> to vector<2x32xf32>
    %65 = vector.extract_strided_slice %62 {offsets = [0, 64], sizes = [2, 32], strides = [1, 1]} : vector<2x96xf32> to vector<2x32xf32>
    %66 = vector.extract_strided_slice %56 {offsets = [0, 96], sizes = [2, 32], strides = [1, 1]} : vector<2x128xf32> to vector<2x32xf32>
    %67 = math.tanh %66 : vector<2x32xf32>
    %68 = arith.mulf %64, %49 : vector<2x32xf32>
    %69 = arith.mulf %63, %67 : vector<2x32xf32>
    %70 = arith.addf %68, %69 : vector<2x32xf32>
    %71 = math.tanh %70 : vector<2x32xf32>
    %72 = arith.mulf %65, %71 : vector<2x32xf32>
    %c4 = arith.constant 4 : index
    %c0_19 = arith.constant 0 : index
    %73 = vector.load %arg15[%c4, %c0_19] : memref<16x32xf32, #tpu.memory_space<vmem>>, vector<2x32xf32>
    tpu.vector_store %arg15[%c4, %c0_19], %72 {strides = array<i32>} : memref<16x32xf32, #tpu.memory_space<vmem>>, vector<2x32xf32>,
    %74 = vector.extract_strided_slice %8 {offsets = [6, 0], sizes = [2, 128], strides = [1, 1]} : vector<16x128xf32> to vector<2x128xf32>
    %75 = arith.truncf %72 : vector<2x32xf32> to vector<2x32xbf16>
    %cst_20 = arith.constant dense<0.000000e+00> : vector<2x128xf32>
    %76 = tpu.matmul %75, %3, %cst_20 {dimension_numbers = #tpu.dot_dimension_numbers<[1], [0], [0], [1], [0, 0, 1, 1], [], []>} : vector<2x32xbf16>, vector<32x128xbf16>, vector<2x128xf32> -> vector<2x128xf32>
    %77 = arith.addf %74, %76 : vector<2x128xf32>
    %78 = vector.extract_strided_slice %77 {offsets = [0, 0], sizes = [2, 96], strides = [1, 1]} : vector<2x128xf32> to vector<2x96xf32>
    %79 = arith.negf %78 : vector<2x96xf32>
    %80 = math.exp %79 : vector<2x96xf32>
    %cst_21 = arith.constant 1.000000e+00 : f32
    %81 = vector.broadcast %cst_21 : f32 to vector<2x96xf32>
    %82 = arith.addf %81, %80 : vector<2x96xf32>
    %83 = arith.divf %81, %82 : vector<2x96xf32>
    %84 = vector.extract_strided_slice %83 {offsets = [0, 0], sizes = [2, 32], strides = [1, 1]} : vector<2x96xf32> to vector<2x32xf32>
    %85 = vector.extract_strided_slice %83 {offsets = [0, 32], sizes = [2, 32], strides = [1, 1]} : vector<2x96xf32> to vector<2x32xf32>
    %86 = vector.extract_strided_slice %83 {offsets = [0, 64], sizes = [2, 32], strides = [1, 1]} : vector<2x96xf32> to vector<2x32xf32>
    %87 = vector.extract_strided_slice %77 {offsets = [0, 96], sizes = [2, 32], strides = [1, 1]} : vector<2x128xf32> to vector<2x32xf32>
    %88 = math.tanh %87 : vector<2x32xf32>
    %89 = arith.mulf %85, %70 : vector<2x32xf32>
    %90 = arith.mulf %84, %88 : vector<2x32xf32>
    %91 = arith.addf %89, %90 : vector<2x32xf32>
    %92 = math.tanh %91 : vector<2x32xf32>
    %93 = arith.mulf %86, %92 : vector<2x32xf32>
    %c6 = arith.constant 6 : index
    %c0_22 = arith.constant 0 : index
    %94 = vector.load %arg15[%c6, %c0_22] : memref<16x32xf32, #tpu.memory_space<vmem>>, vector<2x32xf32>
    tpu.vector_store %arg15[%c6, %c0_22], %93 {strides = array<i32>} : memref<16x32xf32, #tpu.memory_space<vmem>>, vector<2x32xf32>,
    %95 = vector.extract_strided_slice %8 {offsets = [8, 0], sizes = [2, 128], strides = [1, 1]} : vector<16x128xf32> to vector<2x128xf32>
    %96 = arith.truncf %93 : vector<2x32xf32> to vector<2x32xbf16>
    %cst_23 = arith.constant dense<0.000000e+00> : vector<2x128xf32>
    %97 = tpu.matmul %96, %3, %cst_23 {dimension_numbers = #tpu.dot_dimension_numbers<[1], [0], [0], [1], [0, 0, 1, 1], [], []>} : vector<2x32xbf16>, vector<32x128xbf16>, vector<2x128xf32> -> vector<2x128xf32>
    %98 = arith.addf %95, %97 : vector<2x128xf32>
    %99 = vector.extract_strided_slice %98 {offsets = [0, 0], sizes = [2, 96], strides = [1, 1]} : vector<2x128xf32> to vector<2x96xf32>
    %100 = arith.negf %99 : vector<2x96xf32>
    %101 = math.exp %100 : vector<2x96xf32>
    %cst_24 = arith.constant 1.000000e+00 : f32
    %102 = vector.broadcast %cst_24 : f32 to vector<2x96xf32>
    %103 = arith.addf %102, %101 : vector<2x96xf32>
    %104 = arith.divf %102, %103 : vector<2x96xf32>
    %105 = vector.extract_strided_slice %104 {offsets = [0, 0], sizes = [2, 32], strides = [1, 1]} : vector<2x96xf32> to vector<2x32xf32>
    %106 = vector.extract_strided_slice %104 {offsets = [0, 32], sizes = [2, 32], strides = [1, 1]} : vector<2x96xf32> to vector<2x32xf32>
    %107 = vector.extract_strided_slice %104 {offsets = [0, 64], sizes = [2, 32], strides = [1, 1]} : vector<2x96xf32> to vector<2x32xf32>
    %108 = vector.extract_strided_slice %98 {offsets = [0, 96], sizes = [2, 32], strides = [1, 1]} : vector<2x128xf32> to vector<2x32xf32>
    %109 = math.tanh %108 : vector<2x32xf32>
    %110 = arith.mulf %106, %91 : vector<2x32xf32>
    %111 = arith.mulf %105, %109 : vector<2x32xf32>
    %112 = arith.addf %110, %111 : vector<2x32xf32>
    %113 = math.tanh %112 : vector<2x32xf32>
    %114 = arith.mulf %107, %113 : vector<2x32xf32>
    %c8 = arith.constant 8 : index
    %c0_25 = arith.constant 0 : index
    %115 = vector.load %arg15[%c8, %c0_25] : memref<16x32xf32, #tpu.memory_space<vmem>>, vector<2x32xf32>
    tpu.vector_store %arg15[%c8, %c0_25], %114 {strides = array<i32>} : memref<16x32xf32, #tpu.memory_space<vmem>>, vector<2x32xf32>,
    %116 = vector.extract_strided_slice %8 {offsets = [10, 0], sizes = [2, 128], strides = [1, 1]} : vector<16x128xf32> to vector<2x128xf32>
    %117 = arith.truncf %114 : vector<2x32xf32> to vector<2x32xbf16>
    %cst_26 = arith.constant dense<0.000000e+00> : vector<2x128xf32>
    %118 = tpu.matmul %117, %3, %cst_26 {dimension_numbers = #tpu.dot_dimension_numbers<[1], [0], [0], [1], [0, 0, 1, 1], [], []>} : vector<2x32xbf16>, vector<32x128xbf16>, vector<2x128xf32> -> vector<2x128xf32>
    %119 = arith.addf %116, %118 : vector<2x128xf32>
    %120 = vector.extract_strided_slice %119 {offsets = [0, 0], sizes = [2, 96], strides = [1, 1]} : vector<2x128xf32> to vector<2x96xf32>
    %121 = arith.negf %120 : vector<2x96xf32>
    %122 = math.exp %121 : vector<2x96xf32>
    %cst_27 = arith.constant 1.000000e+00 : f32
    %123 = vector.broadcast %cst_27 : f32 to vector<2x96xf32>
    %124 = arith.addf %123, %122 : vector<2x96xf32>
    %125 = arith.divf %123, %124 : vector<2x96xf32>
    %126 = vector.extract_strided_slice %125 {offsets = [0, 0], sizes = [2, 32], strides = [1, 1]} : vector<2x96xf32> to vector<2x32xf32>
    %127 = vector.extract_strided_slice %125 {offsets = [0, 32], sizes = [2, 32], strides = [1, 1]} : vector<2x96xf32> to vector<2x32xf32>
    %128 = vector.extract_strided_slice %125 {offsets = [0, 64], sizes = [2, 32], strides = [1, 1]} : vector<2x96xf32> to vector<2x32xf32>
    %129 = vector.extract_strided_slice %119 {offsets = [0, 96], sizes = [2, 32], strides = [1, 1]} : vector<2x128xf32> to vector<2x32xf32>
    %130 = math.tanh %129 : vector<2x32xf32>
    %131 = arith.mulf %127, %112 : vector<2x32xf32>
    %132 = arith.mulf %126, %130 : vector<2x32xf32>
    %133 = arith.addf %131, %132 : vector<2x32xf32>
    %134 = math.tanh %133 : vector<2x32xf32>
    %135 = arith.mulf %128, %134 : vector<2x32xf32>
    %c10 = arith.constant 10 : index
    %c0_28 = arith.constant 0 : index
    %136 = vector.load %arg15[%c10, %c0_28] : memref<16x32xf32, #tpu.memory_space<vmem>>, vector<2x32xf32>
    tpu.vector_store %arg15[%c10, %c0_28], %135 {strides = array<i32>} : memref<16x32xf32, #tpu.memory_space<vmem>>, vector<2x32xf32>,
    %137 = vector.extract_strided_slice %8 {offsets = [12, 0], sizes = [2, 128], strides = [1, 1]} : vector<16x128xf32> to vector<2x128xf32>
    %138 = arith.truncf %135 : vector<2x32xf32> to vector<2x32xbf16>
    %cst_29 = arith.constant dense<0.000000e+00> : vector<2x128xf32>
    %139 = tpu.matmul %138, %3, %cst_29 {dimension_numbers = #tpu.dot_dimension_numbers<[1], [0], [0], [1], [0, 0, 1, 1], [], []>} : vector<2x32xbf16>, vector<32x128xbf16>, vector<2x128xf32> -> vector<2x128xf32>
    %140 = arith.addf %137, %139 : vector<2x128xf32>
    %141 = vector.extract_strided_slice %140 {offsets = [0, 0], sizes = [2, 96], strides = [1, 1]} : vector<2x128xf32> to vector<2x96xf32>
    %142 = arith.negf %141 : vector<2x96xf32>
    %143 = math.exp %142 : vector<2x96xf32>
    %cst_30 = arith.constant 1.000000e+00 : f32
    %144 = vector.broadcast %cst_30 : f32 to vector<2x96xf32>
    %145 = arith.addf %144, %143 : vector<2x96xf32>
    %146 = arith.divf %144, %145 : vector<2x96xf32>
    %147 = vector.extract_strided_slice %146 {offsets = [0, 0], sizes = [2, 32], strides = [1, 1]} : vector<2x96xf32> to vector<2x32xf32>
    %148 = vector.extract_strided_slice %146 {offsets = [0, 32], sizes = [2, 32], strides = [1, 1]} : vector<2x96xf32> to vector<2x32xf32>
    %149 = vector.extract_strided_slice %146 {offsets = [0, 64], sizes = [2, 32], strides = [1, 1]} : vector<2x96xf32> to vector<2x32xf32>
    %150 = vector.extract_strided_slice %140 {offsets = [0, 96], sizes = [2, 32], strides = [1, 1]} : vector<2x128xf32> to vector<2x32xf32>
    %151 = math.tanh %150 : vector<2x32xf32>
    %152 = arith.mulf %148, %133 : vector<2x32xf32>
    %153 = arith.mulf %147, %151 : vector<2x32xf32>
    %154 = arith.addf %152, %153 : vector<2x32xf32>
    %155 = math.tanh %154 : vector<2x32xf32>
    %156 = arith.mulf %149, %155 : vector<2x32xf32>
    %c12 = arith.constant 12 : index
    %c0_31 = arith.constant 0 : index
    %157 = vector.load %arg15[%c12, %c0_31] : memref<16x32xf32, #tpu.memory_space<vmem>>, vector<2x32xf32>
    tpu.vector_store %arg15[%c12, %c0_31], %156 {strides = array<i32>} : memref<16x32xf32, #tpu.memory_space<vmem>>, vector<2x32xf32>,
    %158 = vector.extract_strided_slice %8 {offsets = [14, 0], sizes = [2, 128], strides = [1, 1]} : vector<16x128xf32> to vector<2x128xf32>
    %159 = arith.truncf %156 : vector<2x32xf32> to vector<2x32xbf16>
    %cst_32 = arith.constant dense<0.000000e+00> : vector<2x128xf32>
    %160 = tpu.matmul %159, %3, %cst_32 {dimension_numbers = #tpu.dot_dimension_numbers<[1], [0], [0], [1], [0, 0, 1, 1], [], []>} : vector<2x32xbf16>, vector<32x128xbf16>, vector<2x128xf32> -> vector<2x128xf32>
    %161 = arith.addf %158, %160 : vector<2x128xf32>
    %162 = vector.extract_strided_slice %161 {offsets = [0, 0], sizes = [2, 96], strides = [1, 1]} : vector<2x128xf32> to vector<2x96xf32>
    %163 = arith.negf %162 : vector<2x96xf32>
    %164 = math.exp %163 : vector<2x96xf32>
    %cst_33 = arith.constant 1.000000e+00 : f32
    %165 = vector.broadcast %cst_33 : f32 to vector<2x96xf32>
    %166 = arith.addf %165, %164 : vector<2x96xf32>
    %167 = arith.divf %165, %166 : vector<2x96xf32>
    %168 = vector.extract_strided_slice %167 {offsets = [0, 0], sizes = [2, 32], strides = [1, 1]} : vector<2x96xf32> to vector<2x32xf32>
    %169 = vector.extract_strided_slice %167 {offsets = [0, 32], sizes = [2, 32], strides = [1, 1]} : vector<2x96xf32> to vector<2x32xf32>
    %170 = vector.extract_strided_slice %167 {offsets = [0, 64], sizes = [2, 32], strides = [1, 1]} : vector<2x96xf32> to vector<2x32xf32>
    %171 = vector.extract_strided_slice %161 {offsets = [0, 96], sizes = [2, 32], strides = [1, 1]} : vector<2x128xf32> to vector<2x32xf32>
    %172 = math.tanh %171 : vector<2x32xf32>
    %173 = arith.mulf %169, %154 : vector<2x32xf32>
    %174 = arith.mulf %168, %172 : vector<2x32xf32>
    %175 = arith.addf %173, %174 : vector<2x32xf32>
    %176 = math.tanh %175 : vector<2x32xf32>
    %177 = arith.mulf %170, %176 : vector<2x32xf32>
    %c14 = arith.constant 14 : index
    %c0_34 = arith.constant 0 : index
    %178 = vector.load %arg15[%c14, %c0_34] : memref<16x32xf32, #tpu.memory_space<vmem>>, vector<2x32xf32>
    tpu.vector_store %arg15[%c14, %c0_34], %177 {strides = array<i32>} : memref<16x32xf32, #tpu.memory_space<vmem>>, vector<2x32xf32>,
    %c0_35 = arith.constant 0 : index
    %c0_36 = arith.constant 0 : index
    %179 = vector.load %arg15[%c0_35, %c0_36] : memref<16x32xf32, #tpu.memory_space<vmem>>, vector<16x32xf32>
    %c0_37 = arith.constant 0 : index
    %180 = memref.load %arg7[%c0_37] : memref<2xf32, #tpu.memory_space<smem>>
    %181 = vector.broadcast %180 : f32 to vector<16x32xf32>
    %182 = arith.mulf %179, %181 : vector<16x32xf32>
    %183 = arith.addf %1, %182 : vector<16x32xf32>
    %c0_38 = arith.constant 0 : index
    %c0_39 = arith.constant 0 : index
    %184 = vector.load %arg4[%c0_38, %c0_39] : memref<32x128xbf16, #tpu.memory_space<vmem>>, vector<32x128xbf16>
    %c0_40 = arith.constant 0 : index
    %c0_41 = arith.constant 0 : index
    %185 = vector.load %arg5[%c0_40, %c0_41] : memref<32x128xbf16, #tpu.memory_space<vmem>>, vector<32x128xbf16>
    %c0_42 = arith.constant 0 : index
    %c0_43 = arith.constant 0 : index
    %186 = vector.load %arg6[%c0_42, %c0_43] : memref<1x128xf32, #tpu.memory_space<vmem>>, vector<1x128xf32>
    %187 = arith.truncf %179 : vector<16x32xf32> to vector<16x32xbf16>
    %cst_44 = arith.constant dense<0.000000e+00> : vector<16x128xf32>
    %188 = tpu.matmul %187, %184, %cst_44 {dimension_numbers = #tpu.dot_dimension_numbers<[1], [0], [0], [1], [0, 0, 1, 1], [], []>} : vector<16x32xbf16>, vector<32x128xbf16>, vector<16x128xf32> -> vector<16x128xf32>
    %189 = vector.broadcast %186 : vector<1x128xf32> to vector<16x128xf32>
    %190 = arith.addf %188, %189 : vector<16x128xf32>
    %cst_45 = arith.constant 0.000000e+00 : f32
    %191 = vector.broadcast %cst_45 : f32 to vector<2x32xf32>
    %cst_46 = arith.constant 0.000000e+00 : f32
    %192 = vector.broadcast %cst_46 : f32 to vector<2x32xf32>
    %193 = vector.extract_strided_slice %190 {offsets = [0, 0], sizes = [2, 128], strides = [1, 1]} : vector<16x128xf32> to vector<2x128xf32>
    %194 = arith.truncf %191 : vector<2x32xf32> to vector<2x32xbf16>
    %cst_47 = arith.constant dense<0.000000e+00> : vector<2x128xf32>
    %195 = tpu.matmul %194, %185, %cst_47 {dimension_numbers = #tpu.dot_dimension_numbers<[1], [0], [0], [1], [0, 0, 1, 1], [], []>} : vector<2x32xbf16>, vector<32x128xbf16>, vector<2x128xf32> -> vector<2x128xf32>
    %196 = arith.addf %193, %195 : vector<2x128xf32>
    %197 = vector.extract_strided_slice %196 {offsets = [0, 0], sizes = [2, 96], strides = [1, 1]} : vector<2x128xf32> to vector<2x96xf32>
    %198 = arith.negf %197 : vector<2x96xf32>
    %199 = math.exp %198 : vector<2x96xf32>
    %cst_48 = arith.constant 1.000000e+00 : f32
    %200 = vector.broadcast %cst_48 : f32 to vector<2x96xf32>
    %201 = arith.addf %200, %199 : vector<2x96xf32>
    %202 = arith.divf %200, %201 : vector<2x96xf32>
    %203 = vector.extract_strided_slice %202 {offsets = [0, 0], sizes = [2, 32], strides = [1, 1]} : vector<2x96xf32> to vector<2x32xf32>
    %204 = vector.extract_strided_slice %202 {offsets = [0, 32], sizes = [2, 32], strides = [1, 1]} : vector<2x96xf32> to vector<2x32xf32>
    %205 = vector.extract_strided_slice %202 {offsets = [0, 64], sizes = [2, 32], strides = [1, 1]} : vector<2x96xf32> to vector<2x32xf32>
    %206 = vector.extract_strided_slice %196 {offsets = [0, 96], sizes = [2, 32], strides = [1, 1]} : vector<2x128xf32> to vector<2x32xf32>
    %207 = math.tanh %206 : vector<2x32xf32>
    %208 = arith.mulf %204, %192 : vector<2x32xf32>
    %209 = arith.mulf %203, %207 : vector<2x32xf32>
    %210 = arith.addf %208, %209 : vector<2x32xf32>
    %211 = math.tanh %210 : vector<2x32xf32>
    %212 = arith.mulf %205, %211 : vector<2x32xf32>
    %c0_49 = arith.constant 0 : index
    %c0_50 = arith.constant 0 : index
    %213 = vector.load %arg15[%c0_49, %c0_50] : memref<16x32xf32, #tpu.memory_space<vmem>>, vector<2x32xf32>
    tpu.vector_store %arg15[%c0_49, %c0_50], %212 {strides = array<i32>} : memref<16x32xf32, #tpu.memory_space<vmem>>, vector<2x32xf32>,
    %214 = vector.extract_strided_slice %190 {offsets = [2, 0], sizes = [2, 128], strides = [1, 1]} : vector<16x128xf32> to vector<2x128xf32>
    %215 = arith.truncf %212 : vector<2x32xf32> to vector<2x32xbf16>
    %cst_51 = arith.constant dense<0.000000e+00> : vector<2x128xf32>
    %216 = tpu.matmul %215, %185, %cst_51 {dimension_numbers = #tpu.dot_dimension_numbers<[1], [0], [0], [1], [0, 0, 1, 1], [], []>} : vector<2x32xbf16>, vector<32x128xbf16>, vector<2x128xf32> -> vector<2x128xf32>
    %217 = arith.addf %214, %216 : vector<2x128xf32>
    %218 = vector.extract_strided_slice %217 {offsets = [0, 0], sizes = [2, 96], strides = [1, 1]} : vector<2x128xf32> to vector<2x96xf32>
    %219 = arith.negf %218 : vector<2x96xf32>
    %220 = math.exp %219 : vector<2x96xf32>
    %cst_52 = arith.constant 1.000000e+00 : f32
    %221 = vector.broadcast %cst_52 : f32 to vector<2x96xf32>
    %222 = arith.addf %221, %220 : vector<2x96xf32>
    %223 = arith.divf %221, %222 : vector<2x96xf32>
    %224 = vector.extract_strided_slice %223 {offsets = [0, 0], sizes = [2, 32], strides = [1, 1]} : vector<2x96xf32> to vector<2x32xf32>
    %225 = vector.extract_strided_slice %223 {offsets = [0, 32], sizes = [2, 32], strides = [1, 1]} : vector<2x96xf32> to vector<2x32xf32>
    %226 = vector.extract_strided_slice %223 {offsets = [0, 64], sizes = [2, 32], strides = [1, 1]} : vector<2x96xf32> to vector<2x32xf32>
    %227 = vector.extract_strided_slice %217 {offsets = [0, 96], sizes = [2, 32], strides = [1, 1]} : vector<2x128xf32> to vector<2x32xf32>
    %228 = math.tanh %227 : vector<2x32xf32>
    %229 = arith.mulf %225, %210 : vector<2x32xf32>
    %230 = arith.mulf %224, %228 : vector<2x32xf32>
    %231 = arith.addf %229, %230 : vector<2x32xf32>
    %232 = math.tanh %231 : vector<2x32xf32>
    %233 = arith.mulf %226, %232 : vector<2x32xf32>
    %c2_53 = arith.constant 2 : index
    %c0_54 = arith.constant 0 : index
    %234 = vector.load %arg15[%c2_53, %c0_54] : memref<16x32xf32, #tpu.memory_space<vmem>>, vector<2x32xf32>
    tpu.vector_store %arg15[%c2_53, %c0_54], %233 {strides = array<i32>} : memref<16x32xf32, #tpu.memory_space<vmem>>, vector<2x32xf32>,
    %235 = vector.extract_strided_slice %190 {offsets = [4, 0], sizes = [2, 128], strides = [1, 1]} : vector<16x128xf32> to vector<2x128xf32>
    %236 = arith.truncf %233 : vector<2x32xf32> to vector<2x32xbf16>
    %cst_55 = arith.constant dense<0.000000e+00> : vector<2x128xf32>
    %237 = tpu.matmul %236, %185, %cst_55 {dimension_numbers = #tpu.dot_dimension_numbers<[1], [0], [0], [1], [0, 0, 1, 1], [], []>} : vector<2x32xbf16>, vector<32x128xbf16>, vector<2x128xf32> -> vector<2x128xf32>
    %238 = arith.addf %235, %237 : vector<2x128xf32>
    %239 = vector.extract_strided_slice %238 {offsets = [0, 0], sizes = [2, 96], strides = [1, 1]} : vector<2x128xf32> to vector<2x96xf32>
    %240 = arith.negf %239 : vector<2x96xf32>
    %241 = math.exp %240 : vector<2x96xf32>
    %cst_56 = arith.constant 1.000000e+00 : f32
    %242 = vector.broadcast %cst_56 : f32 to vector<2x96xf32>
    %243 = arith.addf %242, %241 : vector<2x96xf32>
    %244 = arith.divf %242, %243 : vector<2x96xf32>
    %245 = vector.extract_strided_slice %244 {offsets = [0, 0], sizes = [2, 32], strides = [1, 1]} : vector<2x96xf32> to vector<2x32xf32>
    %246 = vector.extract_strided_slice %244 {offsets = [0, 32], sizes = [2, 32], strides = [1, 1]} : vector<2x96xf32> to vector<2x32xf32>
    %247 = vector.extract_strided_slice %244 {offsets = [0, 64], sizes = [2, 32], strides = [1, 1]} : vector<2x96xf32> to vector<2x32xf32>
    %248 = vector.extract_strided_slice %238 {offsets = [0, 96], sizes = [2, 32], strides = [1, 1]} : vector<2x128xf32> to vector<2x32xf32>
    %249 = math.tanh %248 : vector<2x32xf32>
    %250 = arith.mulf %246, %231 : vector<2x32xf32>
    %251 = arith.mulf %245, %249 : vector<2x32xf32>
    %252 = arith.addf %250, %251 : vector<2x32xf32>
    %253 = math.tanh %252 : vector<2x32xf32>
    %254 = arith.mulf %247, %253 : vector<2x32xf32>
    %c4_57 = arith.constant 4 : index
    %c0_58 = arith.constant 0 : index
    %255 = vector.load %arg15[%c4_57, %c0_58] : memref<16x32xf32, #tpu.memory_space<vmem>>, vector<2x32xf32>
    tpu.vector_store %arg15[%c4_57, %c0_58], %254 {strides = array<i32>} : memref<16x32xf32, #tpu.memory_space<vmem>>, vector<2x32xf32>,
    %256 = vector.extract_strided_slice %190 {offsets = [6, 0], sizes = [2, 128], strides = [1, 1]} : vector<16x128xf32> to vector<2x128xf32>
    %257 = arith.truncf %254 : vector<2x32xf32> to vector<2x32xbf16>
    %cst_59 = arith.constant dense<0.000000e+00> : vector<2x128xf32>
    %258 = tpu.matmul %257, %185, %cst_59 {dimension_numbers = #tpu.dot_dimension_numbers<[1], [0], [0], [1], [0, 0, 1, 1], [], []>} : vector<2x32xbf16>, vector<32x128xbf16>, vector<2x128xf32> -> vector<2x128xf32>
    %259 = arith.addf %256, %258 : vector<2x128xf32>
    %260 = vector.extract_strided_slice %259 {offsets = [0, 0], sizes = [2, 96], strides = [1, 1]} : vector<2x128xf32> to vector<2x96xf32>
    %261 = arith.negf %260 : vector<2x96xf32>
    %262 = math.exp %261 : vector<2x96xf32>
    %cst_60 = arith.constant 1.000000e+00 : f32
    %263 = vector.broadcast %cst_60 : f32 to vector<2x96xf32>
    %264 = arith.addf %263, %262 : vector<2x96xf32>
    %265 = arith.divf %263, %264 : vector<2x96xf32>
    %266 = vector.extract_strided_slice %265 {offsets = [0, 0], sizes = [2, 32], strides = [1, 1]} : vector<2x96xf32> to vector<2x32xf32>
    %267 = vector.extract_strided_slice %265 {offsets = [0, 32], sizes = [2, 32], strides = [1, 1]} : vector<2x96xf32> to vector<2x32xf32>
    %268 = vector.extract_strided_slice %265 {offsets = [0, 64], sizes = [2, 32], strides = [1, 1]} : vector<2x96xf32> to vector<2x32xf32>
    %269 = vector.extract_strided_slice %259 {offsets = [0, 96], sizes = [2, 32], strides = [1, 1]} : vector<2x128xf32> to vector<2x32xf32>
    %270 = math.tanh %269 : vector<2x32xf32>
    %271 = arith.mulf %267, %252 : vector<2x32xf32>
    %272 = arith.mulf %266, %270 : vector<2x32xf32>
    %273 = arith.addf %271, %272 : vector<2x32xf32>
    %274 = math.tanh %273 : vector<2x32xf32>
    %275 = arith.mulf %268, %274 : vector<2x32xf32>
    %c6_61 = arith.constant 6 : index
    %c0_62 = arith.constant 0 : index
    %276 = vector.load %arg15[%c6_61, %c0_62] : memref<16x32xf32, #tpu.memory_space<vmem>>, vector<2x32xf32>
    tpu.vector_store %arg15[%c6_61, %c0_62], %275 {strides = array<i32>} : memref<16x32xf32, #tpu.memory_space<vmem>>, vector<2x32xf32>,
    %277 = vector.extract_strided_slice %190 {offsets = [8, 0], sizes = [2, 128], strides = [1, 1]} : vector<16x128xf32> to vector<2x128xf32>
    %278 = arith.truncf %275 : vector<2x32xf32> to vector<2x32xbf16>
    %cst_63 = arith.constant dense<0.000000e+00> : vector<2x128xf32>
    %279 = tpu.matmul %278, %185, %cst_63 {dimension_numbers = #tpu.dot_dimension_numbers<[1], [0], [0], [1], [0, 0, 1, 1], [], []>} : vector<2x32xbf16>, vector<32x128xbf16>, vector<2x128xf32> -> vector<2x128xf32>
    %280 = arith.addf %277, %279 : vector<2x128xf32>
    %281 = vector.extract_strided_slice %280 {offsets = [0, 0], sizes = [2, 96], strides = [1, 1]} : vector<2x128xf32> to vector<2x96xf32>
    %282 = arith.negf %281 : vector<2x96xf32>
    %283 = math.exp %282 : vector<2x96xf32>
    %cst_64 = arith.constant 1.000000e+00 : f32
    %284 = vector.broadcast %cst_64 : f32 to vector<2x96xf32>
    %285 = arith.addf %284, %283 : vector<2x96xf32>
    %286 = arith.divf %284, %285 : vector<2x96xf32>
    %287 = vector.extract_strided_slice %286 {offsets = [0, 0], sizes = [2, 32], strides = [1, 1]} : vector<2x96xf32> to vector<2x32xf32>
    %288 = vector.extract_strided_slice %286 {offsets = [0, 32], sizes = [2, 32], strides = [1, 1]} : vector<2x96xf32> to vector<2x32xf32>
    %289 = vector.extract_strided_slice %286 {offsets = [0, 64], sizes = [2, 32], strides = [1, 1]} : vector<2x96xf32> to vector<2x32xf32>
    %290 = vector.extract_strided_slice %280 {offsets = [0, 96], sizes = [2, 32], strides = [1, 1]} : vector<2x128xf32> to vector<2x32xf32>
    %291 = math.tanh %290 : vector<2x32xf32>
    %292 = arith.mulf %288, %273 : vector<2x32xf32>
    %293 = arith.mulf %287, %291 : vector<2x32xf32>
    %294 = arith.addf %292, %293 : vector<2x32xf32>
    %295 = math.tanh %294 : vector<2x32xf32>
    %296 = arith.mulf %289, %295 : vector<2x32xf32>
    %c8_65 = arith.constant 8 : index
    %c0_66 = arith.constant 0 : index
    %297 = vector.load %arg15[%c8_65, %c0_66] : memref<16x32xf32, #tpu.memory_space<vmem>>, vector<2x32xf32>
    tpu.vector_store %arg15[%c8_65, %c0_66], %296 {strides = array<i32>} : memref<16x32xf32, #tpu.memory_space<vmem>>, vector<2x32xf32>,
    %298 = vector.extract_strided_slice %190 {offsets = [10, 0], sizes = [2, 128], strides = [1, 1]} : vector<16x128xf32> to vector<2x128xf32>
    %299 = arith.truncf %296 : vector<2x32xf32> to vector<2x32xbf16>
    %cst_67 = arith.constant dense<0.000000e+00> : vector<2x128xf32>
    %300 = tpu.matmul %299, %185, %cst_67 {dimension_numbers = #tpu.dot_dimension_numbers<[1], [0], [0], [1], [0, 0, 1, 1], [], []>} : vector<2x32xbf16>, vector<32x128xbf16>, vector<2x128xf32> -> vector<2x128xf32>
    %301 = arith.addf %298, %300 : vector<2x128xf32>
    %302 = vector.extract_strided_slice %301 {offsets = [0, 0], sizes = [2, 96], strides = [1, 1]} : vector<2x128xf32> to vector<2x96xf32>
    %303 = arith.negf %302 : vector<2x96xf32>
    %304 = math.exp %303 : vector<2x96xf32>
    %cst_68 = arith.constant 1.000000e+00 : f32
    %305 = vector.broadcast %cst_68 : f32 to vector<2x96xf32>
    %306 = arith.addf %305, %304 : vector<2x96xf32>
    %307 = arith.divf %305, %306 : vector<2x96xf32>
    %308 = vector.extract_strided_slice %307 {offsets = [0, 0], sizes = [2, 32], strides = [1, 1]} : vector<2x96xf32> to vector<2x32xf32>
    %309 = vector.extract_strided_slice %307 {offsets = [0, 32], sizes = [2, 32], strides = [1, 1]} : vector<2x96xf32> to vector<2x32xf32>
    %310 = vector.extract_strided_slice %307 {offsets = [0, 64], sizes = [2, 32], strides = [1, 1]} : vector<2x96xf32> to vector<2x32xf32>
    %311 = vector.extract_strided_slice %301 {offsets = [0, 96], sizes = [2, 32], strides = [1, 1]} : vector<2x128xf32> to vector<2x32xf32>
    %312 = math.tanh %311 : vector<2x32xf32>
    %313 = arith.mulf %309, %294 : vector<2x32xf32>
    %314 = arith.mulf %308, %312 : vector<2x32xf32>
    %315 = arith.addf %313, %314 : vector<2x32xf32>
    %316 = math.tanh %315 : vector<2x32xf32>
    %317 = arith.mulf %310, %316 : vector<2x32xf32>
    %c10_69 = arith.constant 10 : index
    %c0_70 = arith.constant 0 : index
    %318 = vector.load %arg15[%c10_69, %c0_70] : memref<16x32xf32, #tpu.memory_space<vmem>>, vector<2x32xf32>
    tpu.vector_store %arg15[%c10_69, %c0_70], %317 {strides = array<i32>} : memref<16x32xf32, #tpu.memory_space<vmem>>, vector<2x32xf32>,
    %319 = vector.extract_strided_slice %190 {offsets = [12, 0], sizes = [2, 128], strides = [1, 1]} : vector<16x128xf32> to vector<2x128xf32>
    %320 = arith.truncf %317 : vector<2x32xf32> to vector<2x32xbf16>
    %cst_71 = arith.constant dense<0.000000e+00> : vector<2x128xf32>
    %321 = tpu.matmul %320, %185, %cst_71 {dimension_numbers = #tpu.dot_dimension_numbers<[1], [0], [0], [1], [0, 0, 1, 1], [], []>} : vector<2x32xbf16>, vector<32x128xbf16>, vector<2x128xf32> -> vector<2x128xf32>
    %322 = arith.addf %319, %321 : vector<2x128xf32>
    %323 = vector.extract_strided_slice %322 {offsets = [0, 0], sizes = [2, 96], strides = [1, 1]} : vector<2x128xf32> to vector<2x96xf32>
    %324 = arith.negf %323 : vector<2x96xf32>
    %325 = math.exp %324 : vector<2x96xf32>
    %cst_72 = arith.constant 1.000000e+00 : f32
    %326 = vector.broadcast %cst_72 : f32 to vector<2x96xf32>
    %327 = arith.addf %326, %325 : vector<2x96xf32>
    %328 = arith.divf %326, %327 : vector<2x96xf32>
    %329 = vector.extract_strided_slice %328 {offsets = [0, 0], sizes = [2, 32], strides = [1, 1]} : vector<2x96xf32> to vector<2x32xf32>
    %330 = vector.extract_strided_slice %328 {offsets = [0, 32], sizes = [2, 32], strides = [1, 1]} : vector<2x96xf32> to vector<2x32xf32>
    %331 = vector.extract_strided_slice %328 {offsets = [0, 64], sizes = [2, 32], strides = [1, 1]} : vector<2x96xf32> to vector<2x32xf32>
    %332 = vector.extract_strided_slice %322 {offsets = [0, 96], sizes = [2, 32], strides = [1, 1]} : vector<2x128xf32> to vector<2x32xf32>
    %333 = math.tanh %332 : vector<2x32xf32>
    %334 = arith.mulf %330, %315 : vector<2x32xf32>
    %335 = arith.mulf %329, %333 : vector<2x32xf32>
    %336 = arith.addf %334, %335 : vector<2x32xf32>
    %337 = math.tanh %336 : vector<2x32xf32>
    %338 = arith.mulf %331, %337 : vector<2x32xf32>
    %c12_73 = arith.constant 12 : index
    %c0_74 = arith.constant 0 : index
    %339 = vector.load %arg15[%c12_73, %c0_74] : memref<16x32xf32, #tpu.memory_space<vmem>>, vector<2x32xf32>
    tpu.vector_store %arg15[%c12_73, %c0_74], %338 {strides = array<i32>} : memref<16x32xf32, #tpu.memory_space<vmem>>, vector<2x32xf32>,
    %340 = vector.extract_strided_slice %190 {offsets = [14, 0], sizes = [2, 128], strides = [1, 1]} : vector<16x128xf32> to vector<2x128xf32>
    %341 = arith.truncf %338 : vector<2x32xf32> to vector<2x32xbf16>
    %cst_75 = arith.constant dense<0.000000e+00> : vector<2x128xf32>
    %342 = tpu.matmul %341, %185, %cst_75 {dimension_numbers = #tpu.dot_dimension_numbers<[1], [0], [0], [1], [0, 0, 1, 1], [], []>} : vector<2x32xbf16>, vector<32x128xbf16>, vector<2x128xf32> -> vector<2x128xf32>
    %343 = arith.addf %340, %342 : vector<2x128xf32>
    %344 = vector.extract_strided_slice %343 {offsets = [0, 0], sizes = [2, 96], strides = [1, 1]} : vector<2x128xf32> to vector<2x96xf32>
    %345 = arith.negf %344 : vector<2x96xf32>
    %346 = math.exp %345 : vector<2x96xf32>
    %cst_76 = arith.constant 1.000000e+00 : f32
    %347 = vector.broadcast %cst_76 : f32 to vector<2x96xf32>
    %348 = arith.addf %347, %346 : vector<2x96xf32>
    %349 = arith.divf %347, %348 : vector<2x96xf32>
    %350 = vector.extract_strided_slice %349 {offsets = [0, 0], sizes = [2, 32], strides = [1, 1]} : vector<2x96xf32> to vector<2x32xf32>
    %351 = vector.extract_strided_slice %349 {offsets = [0, 32], sizes = [2, 32], strides = [1, 1]} : vector<2x96xf32> to vector<2x32xf32>
    %352 = vector.extract_strided_slice %349 {offsets = [0, 64], sizes = [2, 32], strides = [1, 1]} : vector<2x96xf32> to vector<2x32xf32>
    %353 = vector.extract_strided_slice %343 {offsets = [0, 96], sizes = [2, 32], strides = [1, 1]} : vector<2x128xf32> to vector<2x32xf32>
    %354 = math.tanh %353 : vector<2x32xf32>
    %355 = arith.mulf %351, %336 : vector<2x32xf32>
    %356 = arith.mulf %350, %354 : vector<2x32xf32>
    %357 = arith.addf %355, %356 : vector<2x32xf32>
    %358 = math.tanh %357 : vector<2x32xf32>
    %359 = arith.mulf %352, %358 : vector<2x32xf32>
    %c14_77 = arith.constant 14 : index
    %c0_78 = arith.constant 0 : index
    %360 = vector.load %arg15[%c14_77, %c0_78] : memref<16x32xf32, #tpu.memory_space<vmem>>, vector<2x32xf32>
    tpu.vector_store %arg15[%c14_77, %c0_78], %359 {strides = array<i32>} : memref<16x32xf32, #tpu.memory_space<vmem>>, vector<2x32xf32>,
    %c0_79 = arith.constant 0 : index
    %c0_80 = arith.constant 0 : index
    %361 = vector.load %arg15[%c0_79, %c0_80] : memref<16x32xf32, #tpu.memory_space<vmem>>, vector<16x32xf32>
    %c1 = arith.constant 1 : index
    %362 = memref.load %arg7[%c1] : memref<2xf32, #tpu.memory_space<smem>>
    %363 = vector.broadcast %362 : f32 to vector<16x32xf32>
    %364 = arith.mulf %361, %363 : vector<16x32xf32>
    %365 = arith.addf %183, %364 : vector<16x32xf32>
    %c0_81 = arith.constant 0 : index
    %366 = memref.load %arg8[%c0_81] : memref<1xf32, #tpu.memory_space<smem>>
    %367 = vector.broadcast %366 : f32 to vector<16x32xf32>
    %368 = arith.addf %365, %367 : vector<16x32xf32>
    %c0_82 = arith.constant 0 : index
    %c0_83 = arith.constant 0 : index
    %369 = vector.load %arg13[%c0_82, %c0_83] : memref<16x32xf32, #tpu.memory_space<vmem>>, vector<16x32xf32>
    tpu.vector_store %arg13[%c0_82, %c0_83], %368 {strides = array<i32>} : memref<16x32xf32, #tpu.memory_space<vmem>>, vector<16x32xf32>,
    %370 = vector.extract_strided_slice %368 {offsets = [0, 0], sizes = [2, 32], strides = [1, 1]} : vector<16x32xf32> to vector<2x32xf32>
    %371 = vector.extract_strided_slice %368 {offsets = [2, 0], sizes = [2, 32], strides = [1, 1]} : vector<16x32xf32> to vector<2x32xf32>
    %372 = arith.maximumf %370, %371 : vector<2x32xf32>
    %373 = vector.extract_strided_slice %368 {offsets = [4, 0], sizes = [2, 32], strides = [1, 1]} : vector<16x32xf32> to vector<2x32xf32>
    %374 = arith.maximumf %372, %373 : vector<2x32xf32>
    %375 = vector.extract_strided_slice %368 {offsets = [6, 0], sizes = [2, 32], strides = [1, 1]} : vector<16x32xf32> to vector<2x32xf32>
    %376 = arith.maximumf %374, %375 : vector<2x32xf32>
    %377 = vector.extract_strided_slice %368 {offsets = [8, 0], sizes = [2, 32], strides = [1, 1]} : vector<16x32xf32> to vector<2x32xf32>
    %378 = arith.maximumf %376, %377 : vector<2x32xf32>
    %379 = vector.extract_strided_slice %368 {offsets = [10, 0], sizes = [2, 32], strides = [1, 1]} : vector<16x32xf32> to vector<2x32xf32>
    %380 = arith.maximumf %378, %379 : vector<2x32xf32>
    %381 = vector.extract_strided_slice %368 {offsets = [12, 0], sizes = [2, 32], strides = [1, 1]} : vector<16x32xf32> to vector<2x32xf32>
    %382 = arith.maximumf %380, %381 : vector<2x32xf32>
    %383 = vector.extract_strided_slice %368 {offsets = [14, 0], sizes = [2, 32], strides = [1, 1]} : vector<16x32xf32> to vector<2x32xf32>
    %384 = arith.maximumf %382, %383 : vector<2x32xf32>
    %385 = arith.truncf %384 : vector<2x32xf32> to vector<2x32xbf16>
    %c0_84 = arith.constant 0 : index
    %c0_85 = arith.constant 0 : index
    %386 = vector.load %arg9[%c0_84, %c0_85] : memref<32x16xbf16, #tpu.memory_space<vmem>>, vector<32x16xbf16>
    %cst_86 = arith.constant dense<0.000000e+00> : vector<2x16xf32>
    %387 = tpu.matmul %385, %386, %cst_86 {dimension_numbers = #tpu.dot_dimension_numbers<[1], [0], [0], [1], [0, 0, 1, 1], [], []>} : vector<2x32xbf16>, vector<32x16xbf16>, vector<2x16xf32> -> vector<2x16xf32>
    %c0_87 = arith.constant 0 : index
    %c0_88 = arith.constant 0 : index
    %388 = vector.load %arg10[%c0_87, %c0_88] : memref<1x16xf32, #tpu.memory_space<vmem>>, vector<1x16xf32>
    %389 = vector.broadcast %388 : vector<1x16xf32> to vector<2x16xf32>
    %390 = arith.addf %387, %389 : vector<2x16xf32>
    %cst_89 = arith.constant 0.000000e+00 : f32
    %391 = vector.broadcast %cst_89 : f32 to vector<2x16xf32>
    %392 = arith.maximumf %390, %391 : vector<2x16xf32>
    %c0_90 = arith.constant 0 : index
    %c0_91 = arith.constant 0 : index
    %393 = vector.load %arg11[%c0_90, %c0_91] : memref<1x16xf32, #tpu.memory_space<vmem>>, vector<1x16xf32>
    %394 = vector.broadcast %393 : vector<1x16xf32> to vector<2x16xf32>
    %395 = arith.mulf %392, %394 : vector<2x16xf32>
    %cst_92 = arith.constant dense<0.000000e+00> : vector<2xf32>
    %396 = vector.multi_reduction <add>, %395, %cst_92 [1] : vector<2x16xf32> to vector<2xf32>
    %397 = vector.shape_cast %396 : vector<2xf32> to vector<2x1xf32>
    %c0_93 = arith.constant 0 : index
    %398 = memref.load %arg12[%c0_93] : memref<1xf32, #tpu.memory_space<smem>>
    %399 = vector.broadcast %398 : f32 to vector<2x1xf32>
    %400 = arith.addf %397, %399 : vector<2x1xf32>
    %401 = arith.negf %400 : vector<2x1xf32>
    %402 = math.exp %401 : vector<2x1xf32>
    %cst_94 = arith.constant 1.000000e+00 : f32
    %403 = vector.broadcast %cst_94 : f32 to vector<2x1xf32>
    %404 = arith.addf %403, %402 : vector<2x1xf32>
    %405 = arith.divf %403, %404 : vector<2x1xf32>
    %c0_95 = arith.constant 0 : index
    %c0_96 = arith.constant 0 : index
    %406 = vector.load %arg14[%c0_95, %c0_96] : memref<2x1xf32, #tpu.memory_space<vmem>>, vector<2x1xf32>
    tpu.vector_store %arg14[%c0_95, %c0_96], %405 {strides = array<i32>} : memref<2x1xf32, #tpu.memory_space<vmem>>, vector<2x1xf32>,
    return
  }
}

</mosaic_0001>

<bundles_post_ra>
// kernel: elmo_classifier_forward.1
= control target key start
LH: loop header
LB: loop body
LE: loop exit
PB: predicated region body
PF: predicated region fallthrough
CT: control target
= control target key end

     0   :  { %22 = vsyncpa [#allocation6], 0  ;;  %s2579_s0 = inlined_call_operand.vmem [shape: f32[16,32], index: 0, kind: input, shape index: {}]   ;;  %s2580_s1 = inlined_call_operand.vmem [shape: bf16[32,128], index: 1, kind: input, shape index: {}]   ;;  %s2581_s2 = inlined_call_operand.vmem [shape: bf16[32,128], index: 2, kind: input, shape index: {}]   ;;  %s2582_s3 = inlined_call_operand.vmem [shape: f32[1,128], index: 3, kind: input, shape index: {}]   ;;  %s2583_s4 = inlined_call_operand.vmem [shape: bf16[32,128], index: 4, kind: input, shape index: {}]   ;;  %s2584_s5 = inlined_call_operand.vmem [shape: bf16[32,128], index: 5, kind: input, shape index: {}]   ;;  %s2585_s6 = inlined_call_operand.vmem [shape: f32[1,128], index: 6, kind: input, shape index: {}]   ;;  %s2586_s7 = inlined_call_operand.vmem [shape: f32[2], index: 7, kind: input, shape index: {}]   ;;  %s2587_s8 = inlined_call_operand.<no memory space> [shape: f32[1], index: 8, kind: input, shape index: {}]   ;;  %s2588_s9 = inlined_call_operand.vmem [shape: bf16[32,16], index: 9, kind: input, shape index: {}]   ;;  %s2589_s10 = inlined_call_operand.vmem [shape: f32[1,16], index: 10, kind: input, shape index: {}]   ;;  %s2590_s11 = inlined_call_operand.vmem [shape: f32[1,16], index: 11, kind: input, shape index: {}]   ;;  %s2591_s12 = inlined_call_operand.<no memory space> [shape: f32[1], index: 12, kind: input, shape index: {}]   ;;  %s2592_s13 = inlined_call_operand.vmem [shape: f32[16,32], index: 13, kind: output, shape index: {0}]   ;;  %s2593_s14 = inlined_call_operand.vmem [shape: f32[2,1], index: 14, kind: output, shape index: {1}]  }
   0x1   :  { %s43_s15 = sshll.u32 %s2586_s7, 4  ;;  %s44_s15 = int_to_ptr.vmem [resolvable:$true] %s43_s15 }
   0x2   :  { %s2095_s16 = scalar_lea.vmem %s44_s15, 16  ;;  %p2100_p1 = scmp.lt.s32.totalorder %s44_s15, %s44_s15 }
   0x3   :  { %p2096_p0 = scmp.ne.s32.totalorder %s44_s15, %s2095_s16  ;;  %p2101_p2 = scmp.lt.s32.totalorder %s2095_s16, %s2095_s16 }
   0x5   :  { %p2102_p3 = por %p2101_p2, %p2100_p1 }
   0x7   :  { %p2103_p4 = pnand %p2102_p3, %p2096_p0 }
   0x9   :  { %2106 = shalt.err (!%p2103_p4)
}
   0xa   :  { %s2109_s17 = smov [#allocation5]  }
   0xb   :  { %46 = dma.vmem_to_smem %s44_s15, 16, %s2109_s17, [#allocation6]  }
   0xc   :  { %2107 = dma.done.wait [#allocation6], 16  }
   0xd   :  { %2108 = vsyncadd [#allocation6], 4294967280 }
   0xe   :  { %60 = sfence }
   0xf   :  { %v1953_v0 = vld [vmem:[%s2580_s1 + $0x8] sm:$0xff]   ;;  %v2110_v1 = vmov 0.0   ;;  %v1955_v3 = vld [vmem:[%s2580_s1] sm:$0xff]   ;;  %vm2111_vm0 = vmmov 0   ;;  %vm92_vm1 = vcmask 261120   ;;  %v2112_v8 = vmov 0  }
  0x10   :  { %1795 = vmatprep.subr.bf16.mxu0 %v2110_v1  ;;  %1803 = vmatprep.subr.bf16.mxu1 %v2110_v1  ;;  %v2201_v2 = vld [vmem:[%s2581_s2 + $0x8] sm:$0xff]   ;;  %v2213_v4 = vld [vmem:[%s2581_s2] sm:$0xff]   ;;  %s2113_s28 = smov 32   ;;  %vm221_vm2 = vcmask 254976   ;;  %vm390_vm3 = vcmask 259076   ;;  %vm305_vm4 = vcmask 257026  }
  0x11   :  { %1796 = vmatpush3.bf16.msra.mxu0 %v1953_v0  ;;  %1799 = vmatprep.mubr.msk.bf16.mxu0 %vm2111_vm0, %v2110_v1  ;;  %v62_v5 = vld [vmem:[%s2579_s0] sm:$0xff]  ;;  %v63_v6 = vld [vmem:[%s2579_s0 + $0x8] sm:$0xff]  ;;  %vm475_vm5 = vcmask 261126   ;;  %s811_s23 = sld [smem:[#allocation5]]  ;;  %vm1665_vm6 = vcmask 123904   ;;  %vm1678_vm7 = vcmask 1024  }
  0x12   :  { %1804 = vmatpush3.bf16.msra.mxu1 %v2201_v2  ;;  %1797 = vmatprep.subr.bf16.mxu0 %v2110_v1  ;;  %v73_v7 = vpack.c.bf16 %v63_v6, %v62_v5  ;;  %v1689_v9 = vld [vmem:[%s2582_s3] ss:$0 sm:$0xff]  ;;  %s2114_s3 = smov 64   ;;  %s1731_s24 = sld [smem:[#allocation5 + $0x1]] }
  0x13   :  { %1805 = vmatprep.subr.bf16.mxu1 %v2110_v1  ;;  %1807 = vmatprep.mubr.msk.bf16.mxu1 %vm2111_vm0, %v2110_v1 }
  0x15   :  { %1798 = vmatpush3.bf16.msra.mxu0 %v1955_v3 }
  0x16   :  { %1806 = vmatpush3.bf16.msra.mxu1 %v2213_v4  ;;  %1811 = vmatprep.subr.bf16.mxu0 %v2110_v1 }
  0x17   :  { %1819 = vmatprep.subr.bf16.mxu1 %v2110_v1 }
  0x18   :  { %1800 = vmatmul.mubr.msk.bf16.vlgmr.msra.gmra.mxu0 %vm92_vm1, %v73_v7 }
  0x19   :  { %1808 = vmatmul.mubr.bf16.vlgmr.msra.gmra.mxu1 %v2112_v8  ;;  %1812 = vmatpush3.bf16.msra.mxu0 %v2201_v2 }
  0x1a   :  { %1813 = vmatprep.subr.bf16.mxu0 %v2110_v1  ;;  %1815 = vmatprep.mubr.msk.bf16.mxu0 %vm2111_vm0, %v2110_v1 }
  0x1b   :  { %1820 = vmatpush3.bf16.msra.mxu1 %v2201_v2  ;;  %1823 = vmatprep.mubr.msk.bf16.mxu1 %vm2111_vm0, %v2110_v1 }
  0x1c   :  { %1821 = vmatprep.subr.bf16.mxu1 %v2110_v1 }
  0x1d   :  { %1814 = vmatpush3.bf16.msra.mxu0 %v2213_v4 }
  0x1e   :  { %1827 = vmatprep.subr.bf16.mxu0 %v2110_v1 }
  0x1f   :  { %1822 = vmatpush3.bf16.msra.mxu1 %v2213_v4 }
  0x20   :  { %1835 = vmatprep.subr.bf16.mxu1 %v2110_v1 }
  0xd8   :  { %v130_v10 = vpop.f32.mrf.mxu0 }
  0xd9   :  { %v2244_v11 = vadd.f32 %v1689_v9, %v130_v10  ;;  %v186_v12 = vpop.f32.mrf.mxu1 }
  0xda   :  { %v1801_v13 = vpop.f32.mrf.mxu0 }
  0xdb   :  { %v192_v14 = vadd.f32 %v186_v12, %v2244_v11  ;;  %v1809_v15 = vpop.f32.mrf.mxu1 }
  0xdc   :  { %v133_v16 = vpop.f32.mrf.mxu0 }
  0xdd   :  { %1963 = vtanh.f32 %v192_v14  ;;  %v2247_v17 = vadd.f32 %v1689_v9, %v133_v16  ;;  %v189_v18 = vpop.f32.mrf.mxu1  ;;  %v1695_v22 = vmul.f32 -1.442695, %v192_v14 }
  0xde   :  { %v1802_v19 = vpop.f32.mrf.mxu0 }
  0xdf   :  { %v1810_v20 = vpop.f32.mrf.mxu1  ;;  %1965 = vpow2.f32 %v1695_v22 }
  0xea   :  { %v1964_v21 = vpop.eup %1963 }
  0xeb   :  { %202 = vrot.lane.b32.xlu0 %v1964_v21, %s2113_s28 }
  0xec   :  { %v1966_v23 = vpop.eup %1965 }
  0xed   :  { %v196_v24 = vadd.f32 1.0, %v1966_v23 }
  0xef   :  { %1967 = vrcp.f32 %v196_v24 }
  0xfc   :  { %v1968_v25 = vpop.eup %1967 }
  0xfd   :  { %v200_v28 = vmul.f32 0.0, %v1968_v25 }
 0x15d   :  { %v203_v26 = vpop.permute.xlu0 %202 }
 0x15e   :  { %v205_v27 = vmul.f32 %v1968_v25, %v203_v26 }
 0x160   :  { %207 = vrot.lane.b32.xlu0 %v205_v27, %s2113_s28 }
 0x1d2   :  { %v208_v29 = vpop.permute.xlu0 %207 }
 0x1d3   :  { %v210_v30 = vadd.f32 %v208_v29, %v200_v28 }
 0x1d5   :  { %1969 = vtanh.f32 %v210_v30  ;;  %v282_v49 = vrot.slane %v210_v30, 6 }
 0x1e2   :  { %v1970_v31 = vpop.eup %1969 }
 0x1e3   :  { %213 = vrot.lane.b32.xlu1 %v1970_v31, %s2113_s28 }
 0x255   :  { %v214_v32 = vpop.permute.xlu1 %213 }
 0x256   :  { %v2252_v33 = vmul.f32 %v1968_v25, %v214_v32 }
 0x258   :  { %v223_v34 = vpack.c.bf16 %v2252_v33, %v2252_v33 }
 0x25a   :  { %225 = vrot.lane.b32.xlu1 %v223_v34, %s2114_s3 }
 0x2cc   :  { %v226_v35 = vpop.permute.xlu1 %225 }
 0x2cd   :  { %1816 = vmatmul.mubr.msk.bf16.vlgmr.msra.gmra.mxu0 %vm92_vm1, %v226_v35 }
 0x2ce   :  { %1828 = vmatpush3.bf16.msra.mxu0 %v2201_v2  ;;  %1831 = vmatprep.mubr.msk.bf16.mxu0 %vm2111_vm0, %v2110_v1 }
 0x2cf   :  { %1829 = vmatprep.subr.bf16.mxu0 %v2110_v1 }
 0x2d2   :  { %1830 = vmatpush3.bf16.msra.mxu0 %v2213_v4 }
 0x2d3   :  { %1843 = vmatprep.subr.bf16.mxu0 %v2110_v1 }
 0x38d   :  { %v264_v36 = vpop.f32.mrf.mxu0 }
 0x38e   :  { %v271_v37 = vrot.slane %v264_v36, 6 }
 0x38f   :  { %v1817_v38 = vpop.f32.mrf.mxu0 }
 0x390   :  { %v273_v39 = vadd.f32 %v271_v37, %v2244_v11 }
 0x391   :  { %v267_v40 = vpop.f32.mrf.mxu0 }
 0x392   :  { %1971 = vtanh.f32 %v273_v39  ;;  %v1697_v43 = vmul.f32 -1.442695, %v273_v39 }
 0x393   :  { %v1818_v41 = vpop.f32.mrf.mxu0 }
 0x394   :  { %1973 = vpow2.f32 %v1697_v43 }
 0x39f   :  { %v1972_v42 = vpop.eup %1971 }
 0x3a0   :  { %286 = vrot.lane.b32.xlu0 %v1972_v42, %s2113_s28 }
 0x3a1   :  { %v1974_v44 = vpop.eup %1973 }
 0x3a2   :  { %v277_v45 = vadd.f32 1.0, %v1974_v44 }
 0x3a4   :  { %1975 = vrcp.f32 %v277_v45 }
 0x3b1   :  { %v1976_v46 = vpop.eup %1975 }
 0x3b2   :  { %v284_v50 = vmul.f32 %v1976_v46, %v282_v49 }
 0x412   :  { %v287_v47 = vpop.permute.xlu0 %286 }
 0x413   :  { %v289_v48 = vmul.f32 %v1976_v46, %v287_v47 }
 0x415   :  { %291 = vrot.lane.b32.xlu1 %v289_v48, %s2113_s28 }
 0x487   :  { %v292_v51 = vpop.permute.xlu1 %291 }
 0x488   :  { %v294_v52 = vadd.f32 %v292_v51, %v284_v50 }
 0x48a   :  { %1977 = vtanh.f32 %v294_v52  ;;  %v367_v13 = vrot.slane %v294_v52, 6 }
 0x497   :  { %v1978_v53 = vpop.eup %1977 }
 0x498   :  { %297 = vrot.lane.b32.xlu0 %v1978_v53, %s2113_s28 }
 0x50a   :  { %v298_v54 = vpop.permute.xlu0 %297 }
 0x50b   :  { %v2268_v55 = vmul.f32 %v1976_v46, %v298_v54 }
 0x50d   :  { %v307_v56 = vpack.c.bf16 %v2268_v55, %v2268_v55 }
 0x50f   :  { %v309_v57 = vrot.slane %v307_v56, 1 }
 0x511   :  { %310 = vrot.lane.b32.xlu1 %v309_v57, %s2114_s3 }
 0x583   :  { %v311_v58 = vpop.permute.xlu1 %310 }
 0x584   :  { %1824 = vmatmul.mubr.msk.bf16.vlgmr.msra.gmra.mxu1 %vm92_vm1, %v311_v58 }
 0x585   :  { %1836 = vmatpush3.bf16.msra.mxu1 %v2201_v2  ;;  %1839 = vmatprep.mubr.msk.bf16.mxu1 %vm2111_vm0, %v2110_v1 }
 0x586   :  { %1837 = vmatprep.subr.bf16.mxu1 %v2110_v1 }
 0x589   :  { %1838 = vmatpush3.bf16.msra.mxu1 %v2213_v4 }
 0x58a   :  { %1851 = vmatprep.subr.bf16.mxu1 %v2110_v1 }
 0x644   :  { %v349_v59 = vpop.f32.mrf.mxu1 }
 0x645   :  { %v356_v60 = vrot.slane %v349_v59, 4 }
 0x646   :  { %v1825_v61 = vpop.f32.mrf.mxu1 }
 0x647   :  { %v358_v62 = vadd.f32 %v356_v60, %v2244_v11 }
 0x648   :  { %v352_v63 = vpop.f32.mrf.mxu1 }
 0x649   :  { %1979 = vtanh.f32 %v358_v62  ;;  %v1699_v5 = vmul.f32 -1.442695, %v358_v62 }
 0x64a   :  { %v1826_v0 = vpop.f32.mrf.mxu1 }
 0x64b   :  { %1981 = vpow2.f32 %v1699_v5 }
 0x656   :  { %v1980_v3 = vpop.eup %1979 }
 0x657   :  { %371 = vrot.lane.b32.xlu0 %v1980_v3, %s2113_s28 }
 0x658   :  { %v1982_v6 = vpop.eup %1981 }
 0x659   :  { %v362_v7 = vadd.f32 1.0, %v1982_v6 }
 0x65b   :  { %1983 = vrcp.f32 %v362_v7 }
 0x668   :  { %v1984_v9 = vpop.eup %1983 }
 0x669   :  { %v369_v14 = vmul.f32 %v1984_v9, %v367_v13 }
 0x6c9   :  { %v372_v10 = vpop.permute.xlu0 %371 }
 0x6ca   :  { %v374_v12 = vmul.f32 %v1984_v9, %v372_v10 }
 0x6cc   :  { %376 = vrot.lane.b32.xlu1 %v374_v12, %s2113_s28 }
 0x73e   :  { %v377_v15 = vpop.permute.xlu1 %376 }
 0x73f   :  { %v379_v16 = vadd.f32 %v377_v15, %v369_v14 }
 0x741   :  { %1985 = vtanh.f32 %v379_v16  ;;  %v452_v38 = vrot.slane %v379_v16, 6 }
 0x74e   :  { %v1986_v18 = vpop.eup %1985 }
 0x74f   :  { %382 = vrot.lane.b32.xlu0 %v1986_v18, %s2113_s28 }
 0x7c1   :  { %v383_v19 = vpop.permute.xlu0 %382 }
 0x7c2   :  { %v2284_v20 = vmul.f32 %v1984_v9, %v383_v19 }
 0x7c4   :  { %v392_v21 = vpack.c.bf16 %v2284_v20, %v2284_v20 }
 0x7c6   :  { %v394_v22 = vrot.slane %v392_v21, 2 }
 0x7c8   :  { %395 = vrot.lane.b32.xlu1 %v394_v22, %s2114_s3 }
 0x83a   :  { %v396_v23 = vpop.permute.xlu1 %395 }
 0x83b   :  { %1832 = vmatmul.mubr.msk.bf16.vlgmr.msra.gmra.mxu0 %vm92_vm1, %v396_v23 }
 0x83c   :  { %1844 = vmatpush3.bf16.msra.mxu0 %v2201_v2  ;;  %1847 = vmatprep.mubr.msk.bf16.mxu0 %vm2111_vm0, %v2110_v1 }
 0x83d   :  { %1845 = vmatprep.subr.bf16.mxu0 %v2110_v1 }
 0x840   :  { %1846 = vmatpush3.bf16.msra.mxu0 %v2213_v4 }
 0x841   :  { %1859 = vmatprep.subr.bf16.mxu0 %v2110_v1 }
 0x8fb   :  { %v434_v24 = vpop.f32.mrf.mxu0 }
 0x8fc   :  { %v441_v25 = vrot.slane %v434_v24, 2 }
 0x8fd   :  { %v1833_v26 = vpop.f32.mrf.mxu0 }
 0x8fe   :  { %v443_v27 = vadd.f32 %v441_v25, %v2244_v11 }
 0x8ff   :  { %v437_v28 = vpop.f32.mrf.mxu0 }
 0x900   :  { %1987 = vtanh.f32 %v443_v27  ;;  %v1701_v31 = vmul.f32 -1.442695, %v443_v27 }
 0x901   :  { %v1834_v29 = vpop.f32.mrf.mxu0 }
 0x902   :  { %1989 = vpow2.f32 %v1701_v31 }
 0x90d   :  { %v1988_v30 = vpop.eup %1987 }
 0x90e   :  { %456 = vrot.lane.b32.xlu0 %v1988_v30, %s2113_s28 }
 0x90f   :  { %v1990_v32 = vpop.eup %1989 }
 0x910   :  { %v447_v34 = vadd.f32 1.0, %v1990_v32 }
 0x912   :  { %1991 = vrcp.f32 %v447_v34 }
 0x91f   :  { %v1992_v35 = vpop.eup %1991 }
 0x920   :  { %v454_v39 = vmul.f32 %v1992_v35, %v452_v38 }
 0x980   :  { %v457_v36 = vpop.permute.xlu0 %456 }
 0x981   :  { %v459_v37 = vmul.f32 %v1992_v35, %v457_v36 }
 0x983   :  { %461 = vrot.lane.b32.xlu1 %v459_v37, %s2113_s28 }
 0x9f5   :  { %v462_v40 = vpop.permute.xlu1 %461 }
 0x9f6   :  { %v464_v11 = vadd.f32 %v462_v40, %v454_v39 }
 0x9f8   :  { %1993 = vtanh.f32 %v464_v11  ;;  %v534_v60 = vrot.slane %v464_v11, 6 }
 0xa05   :  { %v1994_v41 = vpop.eup %1993 }
 0xa06   :  { %467 = vrot.lane.b32.xlu0 %v1994_v41, %s2113_s28 }
 0xa78   :  { %v468_v42 = vpop.permute.xlu0 %467 }
 0xa79   :  { %v2300_v43 = vmul.f32 %v1992_v35, %v468_v42 }
 0xa7b   :  { %v477_v44 = vpack.c.bf16 %v2300_v43, %v2300_v43 }
 0xa7d   :  { %v479_v45 = vrot.slane %v477_v44, 3 }
 0xa7f   :  { %480 = vrot.lane.b32.xlu1 %v479_v45, %s2114_s3 }
 0xaf1   :  { %v481_v46 = vpop.permute.xlu1 %480 }
 0xaf2   :  { %1840 = vmatmul.mubr.msk.bf16.vlgmr.msra.gmra.mxu1 %vm92_vm1, %v481_v46 }
 0xaf3   :  { %1852 = vmatpush3.bf16.msra.mxu1 %v2201_v2  ;;  %1855 = vmatprep.mubr.msk.bf16.mxu1 %vm2111_vm0, %v2110_v1 }
 0xaf4   :  { %1853 = vmatprep.subr.bf16.mxu1 %v2110_v1 }
 0xaf7   :  { %1854 = vmatpush3.bf16.msra.mxu1 %v2213_v4 }
 0xaf8   :  { %1867 = vmatprep.subr.bf16.mxu1 %v2110_v1 }
 0xbb2   :  { %v519_v47 = vpop.f32.mrf.mxu1 }
 0xbb3   :  { %v525_v48 = vadd.f32 %v519_v47, %v2247_v17 }
 0xbb4   :  { %v1841_v49 = vpop.f32.mrf.mxu1 }
 0xbb5   :  { %1995 = vtanh.f32 %v525_v48  ;;  %v1703_v53 = vmul.f32 -1.442695, %v525_v48 }
 0xbb6   :  { %v522_v50 = vpop.f32.mrf.mxu1 }
 0xbb7   :  { %1997 = vpow2.f32 %v1703_v53 }
 0xbb8   :  { %v1842_v51 = vpop.f32.mrf.mxu1 }
 0xbc2   :  { %v1996_v52 = vpop.eup %1995 }
 0xbc3   :  { %538 = vrot.lane.b32.xlu0 %v1996_v52, %s2113_s28 }
 0xbc4   :  { %v1998_v54 = vpop.eup %1997 }
 0xbc5   :  { %v529_v56 = vadd.f32 1.0, %v1998_v54 }
 0xbc7   :  { %1999 = vrcp.f32 %v529_v56 }
 0xbd4   :  { %v2000_v57 = vpop.eup %1999 }
 0xbd5   :  { %v536_v61 = vmul.f32 %v2000_v57, %v534_v60 }
 0xc35   :  { %v539_v58 = vpop.permute.xlu0 %538 }
 0xc36   :  { %v541_v59 = vmul.f32 %v2000_v57, %v539_v58 }
 0xc38   :  { %543 = vrot.lane.b32.xlu1 %v541_v59, %s2113_s28 }
 0xcaa   :  { %v544_v62 = vpop.permute.xlu1 %543 }
 0xcab   :  { %v546_v63 = vadd.f32 %v544_v62, %v536_v61 }
 0xcad   :  { %2001 = vtanh.f32 %v546_v63  ;;  %v617_v23 = vrot.slane %v546_v63, 6 }
 0xcba   :  { %v2002_v0 = vpop.eup %2001 }
 0xcbb   :  { %549 = vrot.lane.b32.xlu0 %v2002_v0, %s2113_s28 }
 0xd2d   :  { %v550_v3 = vpop.permute.xlu0 %549 }
 0xd2e   :  { %v2316_v5 = vmul.f32 %v2000_v57, %v550_v3 }
 0xd30   :  { %v558_v6 = vpack.c.bf16 %v2316_v5, %v2316_v5 }
 0xd32   :  { %560 = vrot.lane.b32.xlu1 %v558_v6, %s2114_s3 }
 0xda4   :  { %v561_v7 = vpop.permute.xlu1 %560 }
 0xda5   :  { %1848 = vmatmul.mubr.msk.bf16.vlgmr.msra.gmra.mxu0 %vm92_vm1, %v561_v7 }
 0xda6   :  { %1860 = vmatpush3.bf16.msra.mxu0 %v2201_v2  ;;  %1863 = vmatprep.mubr.msk.bf16.mxu0 %vm2111_vm0, %v2110_v1 }
 0xda7   :  { %1861 = vmatprep.subr.bf16.mxu0 %v2110_v1 }
 0xdaa   :  { %1862 = vmatpush3.bf16.msra.mxu0 %v2213_v4 }
 0xdab   :  { %1875 = vmatprep.subr.bf16.mxu0 %v2110_v1 }
 0xe65   :  { %v599_v9 = vpop.f32.mrf.mxu0 }
 0xe66   :  { %v606_v10 = vrot.slane %v599_v9, 6 }
 0xe67   :  { %v1849_v12 = vpop.f32.mrf.mxu0 }
 0xe68   :  { %v608_v13 = vadd.f32 %v606_v10, %v2247_v17 }
 0xe69   :  { %v602_v14 = vpop.f32.mrf.mxu0 }
 0xe6a   :  { %2003 = vtanh.f32 %v608_v13  ;;  %v1705_v2 = vmul.f32 -1.442695, %v608_v13 }
 0xe6b   :  { %v1850_v15 = vpop.f32.mrf.mxu0 }
 0xe6c   :  { %2005 = vpow2.f32 %v1705_v2 }
 0xe77   :  { %v2004_v16 = vpop.eup %2003 }
 0xe78   :  { %621 = vrot.lane.b32.xlu0 %v2004_v16, %s2113_s28 }
 0xe79   :  { %v2006_v18 = vpop.eup %2005 }
 0xe7a   :  { %v612_v19 = vadd.f32 1.0, %v2006_v18  ;;  %v2364_v18 = vld [vmem:[%s2584_s5 + $0x8] sm:$0xff]  }
 0xe7c   :  { %2007 = vrcp.f32 %v612_v19  ;;  %v1958_v19 = vld [vmem:[%s2583_s4 + $0x8] sm:$0xff]  }
 0xe89   :  { %v2008_v21 = vpop.eup %2007 }
 0xe8a   :  { %v619_v24 = vmul.f32 %v2008_v21, %v617_v23 }
 0xeea   :  { %v622_v4 = vpop.permute.xlu0 %621 }
 0xeeb   :  { %v624_v22 = vmul.f32 %v2008_v21, %v622_v4 }
 0xeed   :  { %626 = vrot.lane.b32.xlu1 %v624_v22, %s2113_s28 }
 0xf5f   :  { %v627_v25 = vpop.permute.xlu1 %626 }
 0xf60   :  { %v629_v26 = vadd.f32 %v627_v25, %v619_v24 }
 0xf62   :  { %2009 = vtanh.f32 %v629_v26  ;;  %v701_v47 = vrot.slane %v629_v26, 6 }
 0xf6f   :  { %v2010_v27 = vpop.eup %2009 }
 0xf70   :  { %632 = vrot.lane.b32.xlu0 %v2010_v27, %s2113_s28 }
 0xfe2   :  { %v633_v28 = vpop.permute.xlu0 %632 }
 0xfe3   :  { %v2332_v29 = vmul.f32 %v2008_v21, %v633_v28  ;;  %v2382_v21 = vld [vmem:[%s2584_s5] sm:$0xff]  }
 0xfe5   :  { %v641_v30 = vpack.c.bf16 %v2332_v29, %v2332_v29 }
 0xfe7   :  { %v643_v31 = vrot.slane %v641_v30, 1 }
 0xfe9   :  { %644 = vrot.lane.b32.xlu1 %v643_v31, %s2114_s3 }
0x105b   :  { %v645_v32 = vpop.permute.xlu1 %644 }
0x105c   :  { %1856 = vmatmul.mubr.msk.bf16.vlgmr.msra.gmra.mxu1 %vm92_vm1, %v645_v32  ;;  %v1710_v32 = vld [vmem:[%s2585_s6] ss:$0 sm:$0xff] }
0x105d   :  { %1871 = vmatprep.mubr.msk.bf16.mxu1 %vm2111_vm0, %v2110_v1  ;;  %1868 = vmatpush3.bf16.msra.mxu1 %v1958_v19 }
0x105e   :  { %1869 = vmatprep.subr.bf16.mxu1 %v2110_v1 }
0x111c   :  { %v683_v34 = vpop.f32.mrf.mxu1 }
0x111d   :  { %v690_v35 = vrot.slane %v683_v34, 4 }
0x111e   :  { %v1857_v36 = vpop.f32.mrf.mxu1 }
0x111f   :  { %v692_v37 = vadd.f32 %v690_v35, %v2247_v17 }
0x1120   :  { %v686_v38 = vpop.f32.mrf.mxu1 }
0x1121   :  { %2011 = vtanh.f32 %v692_v37  ;;  %v1707_v11 = vmul.f32 -1.442695, %v692_v37 }
0x1122   :  { %v1858_v39 = vpop.f32.mrf.mxu1 }
0x1123   :  { %2013 = vpow2.f32 %v1707_v11 }
0x112e   :  { %v2012_v40 = vpop.eup %2011 }
0x112f   :  { %705 = vrot.lane.b32.xlu0 %v2012_v40, %s2113_s28 }
0x1130   :  { %v2014_v41 = vpop.eup %2013 }
0x1131   :  { %v696_v42 = vadd.f32 1.0, %v2014_v41 }
0x1133   :  { %2015 = vrcp.f32 %v696_v42 }
0x1140   :  { %v2016_v44 = vpop.eup %2015 }
0x1141   :  { %v703_v48 = vmul.f32 %v2016_v44, %v701_v47 }
0x11a1   :  { %v706_v45 = vpop.permute.xlu0 %705 }
0x11a2   :  { %v708_v46 = vmul.f32 %v2016_v44, %v706_v45 }
0x11a4   :  { %710 = vrot.lane.b32.xlu1 %v708_v46, %s2113_s28 }
0x1216   :  { %v711_v49 = vpop.permute.xlu1 %710 }
0x1217   :  { %v713_v50 = vadd.f32 %v711_v49, %v703_v48 }
0x1219   :  { %2017 = vtanh.f32 %v713_v50 }
0x1226   :  { %v2018_v51 = vpop.eup %2017 }
0x1227   :  { %716 = vrot.lane.b32.xlu0 %v2018_v51, %s2113_s28 }
0x1299   :  { %v717_v52 = vpop.permute.xlu0 %716 }
0x129a   :  { %v719_v53 = vmul.f32 %v2016_v44, %v717_v52 }
0x129c   :  { %v725_v54 = vpack.c.bf16 %v719_v53, %v719_v53 }
0x129e   :  { %v727_v56 = vrot.slane %v725_v54, 2 }
0x12a0   :  { %728 = vrot.lane.b32.xlu1 %v727_v56, %s2114_s3 }
0x1312   :  { %v729_v57 = vpop.permute.xlu1 %728 }
0x1313   :  { %1864 = vmatmul.mubr.msk.bf16.vlgmr.msra.gmra.mxu0 %vm92_vm1, %v729_v57 }
0x1314   :  { %1879 = vmatprep.mubr.msk.bf16.mxu0 %vm2111_vm0, %v2110_v1  ;;  %1876 = vmatpush3.bf16.msra.mxu0 %v2364_v18 }
0x1315   :  { %1877 = vmatprep.subr.bf16.mxu0 %v2110_v1 }
0x1318   :  { %1878 = vmatpush3.bf16.msra.mxu0 %v2382_v21 }
0x1319   :  { %1891 = vmatprep.subr.bf16.mxu0 %v2110_v1 }
0x131b   :  { %1880 = vmatmul.mubr.bf16.vlgmr.msra.gmra.mxu0 %v2112_v8 }
0x131c   :  { %1892 = vmatpush3.bf16.msra.mxu0 %v2364_v18  ;;  %1895 = vmatprep.mubr.msk.bf16.mxu0 %vm2111_vm0, %v2110_v1 }
0x131d   :  { %1893 = vmatprep.subr.bf16.mxu0 %v2110_v1 }
0x1320   :  { %1894 = vmatpush3.bf16.msra.mxu0 %v2382_v21 }
0x1321   :  { %1907 = vmatprep.subr.bf16.mxu0 %v2110_v1 }
0x13d3   :  { %v767_v58 = vpop.f32.mrf.mxu0 }
0x13d4   :  { %v774_v59 = vrot.slane %v767_v58, 2 }
0x13d5   :  { %v1865_v60 = vpop.f32.mrf.mxu0 }
0x13d6   :  { %v776_v61 = vadd.f32 %v774_v59, %v2247_v17  ;;  %v785_v17 = vrot.slane %v713_v50, 6 }
0x13d7   :  { %v770_v62 = vpop.f32.mrf.mxu0 }
0x13d8   :  { %2019 = vtanh.f32 %v776_v61  ;;  %v1709_v3 = vmul.f32 -1.442695, %v776_v61 }
0x13d9   :  { %v1866_v63 = vpop.f32.mrf.mxu0 }
0x13da   :  { %2021 = vpow2.f32 %v1709_v3 }
0x13db   :  { %v935_v28 = vpop.f32.mrf.mxu0 }
0x13e5   :  { %v2020_v0 = vpop.eup %2019 }
0x13e6   :  { %789 = vrot.lane.b32.xlu0 %v2020_v0, %s2113_s28 }
0x13e7   :  { %v2022_v6 = vpop.eup %2021 }
0x13e8   :  { %v780_v7 = vadd.f32 1.0, %v2022_v6 }
0x13ea   :  { %2023 = vrcp.f32 %v780_v7 }
0x13f7   :  { %v2024_v9 = vpop.eup %2023 }
0x13f8   :  { %v787_v13 = vmul.f32 %v2024_v9, %v785_v17 }
0x1458   :  { %v790_v10 = vpop.permute.xlu0 %789 }
0x1459   :  { %v792_v12 = vmul.f32 %v2024_v9, %v790_v10 }
0x145b   :  { %794 = vrot.lane.b32.xlu1 %v792_v12, %s2113_s28 }
0x145f   :  { %218 = vrot.lane.b32.xlu1 %v2252_v33, %s2114_s3 }
0x1463   :  { %387 = vrot.lane.b32.xlu1 %v2284_v20, %s2114_s3 }
0x1467   :  { %554 = vrot.lane.b32.xlu1 %v2316_v5, %s2114_s3 }
0x146b   :  { %721 = vrot.lane.b32.xlu1 %v719_v53, %s2114_s3 }
0x14cd   :  { %v795_v14 = vpop.permute.xlu1 %794 }
0x14ce   :  { %v797_v15 = vadd.f32 %v795_v14, %v787_v13 }
0x14d0   :  { %2025 = vtanh.f32 %v797_v15 }
0x14d1   :  { %v219_v16 = vpop.permute.xlu1 %218 }
0x14d2   :  { %222 = vst.msk [vmem:[#allocation2] sm:$0x3] %vm221_vm2, %v219_v16 }
0x14d5   :  { %v388_v2 = vpop.permute.xlu1 %387 }
0x14d6   :  { %391 = vst.msk [vmem:[#allocation2] sm:$0x30] %vm390_vm3, %v388_v2 }
0x14d9   :  { %v555_v33 = vpop.permute.xlu1 %554 }
0x14da   :  { %557 = vst.msk [vmem:[#allocation2 + $0x8] sm:$0x3] %vm221_vm2, %v555_v33 }
0x14dd   :  { %v2026_v20 = vpop.eup %2025  ;;  %v722_v5 = vpop.permute.xlu1 %721 }
0x14de   :  { %724 = vst.msk [vmem:[#allocation2 + $0x8] sm:$0x30] %vm390_vm3, %v722_v5  ;;  %800 = vrot.lane.b32.xlu0 %v2026_v20, %s2113_s28 }
0x14e2   :  { %302 = vrot.lane.b32.xlu0 %v2268_v55, %s2114_s3  ;;  %v1960_v55 = vld [vmem:[%s2583_s4] sm:$0xff]  }
0x14e3   :  { %1870 = vmatpush3.bf16.msra.mxu1 %v1960_v55 }
0x14e4   :  { %1883 = vmatprep.subr.bf16.mxu1 %v2110_v1 }
0x14e6   :  { %472 = vrot.lane.b32.xlu0 %v2300_v43, %s2114_s3 }
0x14ea   :  { %637 = vrot.lane.b32.xlu0 %v2332_v29, %s2114_s3  ;;  %v1881_v29 = vpop.f32.mrf.mxu0 }
0x14ec   :  { %v938_v30 = vpop.f32.mrf.mxu0 }
0x14ee   :  { %v1882_v31 = vpop.f32.mrf.mxu0 }
0x1550   :  { %v801_v43 = vpop.permute.xlu0 %800 }
0x1551   :  { %v803_v4 = vmul.f32 %v2024_v9, %v801_v43 }
0x1553   :  { %805 = vrot.lane.b32.xlu0 %v803_v4, %s2114_s3 }
0x1554   :  { %v303_v8 = vpop.permute.xlu0 %302 }
0x1555   :  { %306 = vst.msk [vmem:[#allocation2] sm:$0xc] %vm305_vm4, %v303_v8 }
0x1558   :  { %v473_v22 = vpop.permute.xlu0 %472 }
0x1559   :  { %476 = vst.msk [vmem:[#allocation2] sm:$0xc0] %vm475_vm5, %v473_v22 }
0x155c   :  { %v638_v23 = vpop.permute.xlu0 %637 }
0x155d   :  { %640 = vst.msk [vmem:[#allocation2 + $0x8] sm:$0xc] %vm305_vm4, %v638_v23 }
0x1560   :  { %v2403_v25 = vld [vmem:[#allocation2] sm:$0xff] }
0x15c5   :  { %v806_v24 = vpop.permute.xlu0 %805 }
0x15c6   :  { %808 = vst.msk [vmem:[#allocation2 + $0x8] sm:$0xc0] %vm475_vm5, %v806_v24 }
0x15cd   :  { %v2405_v26 = vld [vmem:[#allocation2 + $0x8] sm:$0xff] }
0x15ce   :  { %v826_v27 = vpack.c.bf16 %v2405_v26, %v2403_v25 }
0x15d0   :  { %1872 = vmatmul.mubr.msk.bf16.vlgmr.msra.gmra.mxu1 %vm92_vm1, %v826_v27 }
0x15d1   :  { %1884 = vmatpush3.bf16.msra.mxu1 %v2364_v18  ;;  %1887 = vmatprep.mubr.msk.bf16.mxu1 %vm2111_vm0, %v2110_v1 }
0x15d2   :  { %1885 = vmatprep.subr.bf16.mxu1 %v2110_v1 }
0x15d5   :  { %1886 = vmatpush3.bf16.msra.mxu1 %v2382_v21 }
0x15d6   :  { %1899 = vmatprep.subr.bf16.mxu1 %v2110_v1 }
0x1690   :  { %v882_v34 = vpop.f32.mrf.mxu1 }
0x1691   :  { %v2419_v35 = vadd.f32 %v1710_v32, %v882_v34 }
0x1692   :  { %v1873_v36 = vpop.f32.mrf.mxu1 }
0x1693   :  { %v941_v37 = vadd.f32 %v935_v28, %v2419_v35 }
0x1694   :  { %v885_v38 = vpop.f32.mrf.mxu1 }
0x1695   :  { %2027 = vtanh.f32 %v941_v37  ;;  %v2422_v39 = vadd.f32 %v1710_v32, %v885_v38  ;;  %v1716_v41 = vmul.f32 -1.442695, %v941_v37 }
0x1696   :  { %v1874_v40 = vpop.f32.mrf.mxu1 }
0x1697   :  { %2029 = vpow2.f32 %v1716_v41 }
0x16a2   :  { %v2028_v11 = vpop.eup %2027 }
0x16a3   :  { %951 = vrot.lane.b32.xlu1 %v2028_v11, %s2113_s28 }
0x16a4   :  { %v2030_v42 = vpop.eup %2029 }
0x16a5   :  { %v945_v44 = vadd.f32 1.0, %v2030_v42 }
0x16a7   :  { %2031 = vrcp.f32 %v945_v44 }
0x16b4   :  { %v2032_v45 = vpop.eup %2031 }
0x16b5   :  { %v949_v48 = vmul.f32 0.0, %v2032_v45 }
0x1715   :  { %v952_v46 = vpop.permute.xlu1 %951 }
0x1716   :  { %v954_v47 = vmul.f32 %v2032_v45, %v952_v46 }
0x1718   :  { %956 = vrot.lane.b32.xlu0 %v954_v47, %s2113_s28 }
0x178a   :  { %v957_v49 = vpop.permute.xlu0 %956 }
0x178b   :  { %v959_v50 = vadd.f32 %v957_v49, %v949_v48 }
0x178d   :  { %2033 = vtanh.f32 %v959_v50  ;;  %v1030_v12 = vrot.slane %v959_v50, 6 }
0x179a   :  { %v2034_v51 = vpop.eup %2033 }
0x179b   :  { %962 = vrot.lane.b32.xlu1 %v2034_v51, %s2113_s28 }
0x180d   :  { %v963_v52 = vpop.permute.xlu1 %962 }
0x180e   :  { %v2427_v53 = vmul.f32 %v2032_v45, %v963_v52 }
0x1810   :  { %v971_v54 = vpack.c.bf16 %v2427_v53, %v2427_v53 }
0x1812   :  { %973 = vrot.lane.b32.xlu0 %v971_v54, %s2114_s3 }
0x1884   :  { %v974_v56 = vpop.permute.xlu0 %973 }
0x1885   :  { %1888 = vmatmul.mubr.msk.bf16.vlgmr.msra.gmra.mxu1 %vm92_vm1, %v974_v56 }
0x1886   :  { %1900 = vmatpush3.bf16.msra.mxu1 %v2364_v18  ;;  %1903 = vmatprep.mubr.msk.bf16.mxu1 %vm2111_vm0, %v2110_v1 }
0x1887   :  { %1901 = vmatprep.subr.bf16.mxu1 %v2110_v1 }
0x188a   :  { %1902 = vmatpush3.bf16.msra.mxu1 %v2382_v21 }
0x188b   :  { %1915 = vmatprep.subr.bf16.mxu1 %v2110_v1 }
0x1945   :  { %v1012_v57 = vpop.f32.mrf.mxu1 }
0x1946   :  { %v1019_v58 = vrot.slane %v1012_v57, 6 }
0x1947   :  { %v1889_v59 = vpop.f32.mrf.mxu1 }
0x1948   :  { %v1021_v60 = vadd.f32 %v1019_v58, %v2419_v35 }
0x1949   :  { %v1015_v61 = vpop.f32.mrf.mxu1 }
0x194a   :  { %2035 = vtanh.f32 %v1021_v60  ;;  %v1718_v0 = vmul.f32 -1.442695, %v1021_v60 }
0x194b   :  { %v1890_v62 = vpop.f32.mrf.mxu1 }
0x194c   :  { %2037 = vpow2.f32 %v1718_v0 }
0x1957   :  { %v2036_v63 = vpop.eup %2035 }
0x1958   :  { %1034 = vrot.lane.b32.xlu1 %v2036_v63, %s2113_s28 }
0x1959   :  { %v2038_v3 = vpop.eup %2037 }
0x195a   :  { %v1025_v6 = vadd.f32 1.0, %v2038_v3 }
0x195c   :  { %2039 = vrcp.f32 %v1025_v6 }
0x1969   :  { %v2040_v7 = vpop.eup %2039 }
0x196a   :  { %v1032_v17 = vmul.f32 %v2040_v7, %v1030_v12 }
0x19ca   :  { %v1035_v9 = vpop.permute.xlu1 %1034 }
0x19cb   :  { %v1037_v10 = vmul.f32 %v2040_v7, %v1035_v9 }
0x19cd   :  { %1039 = vrot.lane.b32.xlu0 %v1037_v10, %s2113_s28 }
0x1a3f   :  { %v1040_v13 = vpop.permute.xlu0 %1039 }
0x1a40   :  { %v1042_v14 = vadd.f32 %v1040_v13, %v1032_v17 }
0x1a42   :  { %2041 = vtanh.f32 %v1042_v14  ;;  %v1114_v32 = vrot.slane %v1042_v14, 6 }
0x1a4f   :  { %v2042_v15 = vpop.eup %2041 }
0x1a50   :  { %1045 = vrot.lane.b32.xlu1 %v2042_v15, %s2113_s28 }
0x1ac2   :  { %v1046_v16 = vpop.permute.xlu1 %1045 }
0x1ac3   :  { %v2443_v2 = vmul.f32 %v2040_v7, %v1046_v16 }
0x1ac5   :  { %v1054_v33 = vpack.c.bf16 %v2443_v2, %v2443_v2 }
0x1ac7   :  { %v1056_v20 = vrot.slane %v1054_v33, 1 }
0x1ac9   :  { %1057 = vrot.lane.b32.xlu0 %v1056_v20, %s2114_s3 }
0x1b3b   :  { %v1058_v5 = vpop.permute.xlu0 %1057 }
0x1b3c   :  { %1896 = vmatmul.mubr.msk.bf16.vlgmr.msra.gmra.mxu0 %vm92_vm1, %v1058_v5 }
0x1b3d   :  { %1908 = vmatpush3.bf16.msra.mxu0 %v2364_v18  ;;  %1911 = vmatprep.mubr.msk.bf16.mxu0 %vm2111_vm0, %v2110_v1 }
0x1b3e   :  { %1909 = vmatprep.subr.bf16.mxu0 %v2110_v1 }
0x1b41   :  { %1910 = vmatpush3.bf16.msra.mxu0 %v2382_v21 }
0x1b42   :  { %1923 = vmatprep.subr.bf16.mxu0 %v2110_v1 }
0x1bfc   :  { %v1096_v19 = vpop.f32.mrf.mxu0 }
0x1bfd   :  { %v1103_v55 = vrot.slane %v1096_v19, 4 }
0x1bfe   :  { %v1897_v43 = vpop.f32.mrf.mxu0 }
0x1bff   :  { %v1105_v4 = vadd.f32 %v1103_v55, %v2419_v35 }
0x1c00   :  { %v1099_v8 = vpop.f32.mrf.mxu0 }
0x1c01   :  { %2043 = vtanh.f32 %v1105_v4  ;;  %v1720_v24 = vmul.f32 -1.442695, %v1105_v4 }
0x1c02   :  { %v1898_v22 = vpop.f32.mrf.mxu0 }
0x1c03   :  { %2045 = vpow2.f32 %v1720_v24 }
0x1c0e   :  { %v2044_v23 = vpop.eup %2043 }
0x1c0f   :  { %1118 = vrot.lane.b32.xlu1 %v2044_v23, %s2113_s28 }
0x1c10   :  { %v2046_v27 = vpop.eup %2045 }
0x1c11   :  { %v1109_v28 = vadd.f32 1.0, %v2046_v27 }
0x1c13   :  { %2047 = vrcp.f32 %v1109_v28 }
0x1c20   :  { %v2048_v29 = vpop.eup %2047 }
0x1c21   :  { %v1116_v34 = vmul.f32 %v2048_v29, %v1114_v32 }
0x1c81   :  { %v1119_v30 = vpop.permute.xlu1 %1118 }
0x1c82   :  { %v1121_v31 = vmul.f32 %v2048_v29, %v1119_v30 }
0x1c84   :  { %1123 = vrot.lane.b32.xlu0 %v1121_v31, %s2113_s28 }
0x1cf6   :  { %v1124_v36 = vpop.permute.xlu0 %1123 }
0x1cf7   :  { %v1126_v37 = vadd.f32 %v1124_v36, %v1116_v34 }
0x1cf9   :  { %2049 = vtanh.f32 %v1126_v37  ;;  %v1198_v60 = vrot.slane %v1126_v37, 6 }
0x1d06   :  { %v2050_v38 = vpop.eup %2049 }
0x1d07   :  { %1129 = vrot.lane.b32.xlu1 %v2050_v38, %s2113_s28 }
0x1d79   :  { %v1130_v40 = vpop.permute.xlu1 %1129 }
0x1d7a   :  { %v2459_v11 = vmul.f32 %v2048_v29, %v1130_v40 }
0x1d7c   :  { %v1138_v41 = vpack.c.bf16 %v2459_v11, %v2459_v11 }
0x1d7e   :  { %v1140_v42 = vrot.slane %v1138_v41, 2 }
0x1d80   :  { %1141 = vrot.lane.b32.xlu0 %v1140_v42, %s2114_s3 }
0x1df2   :  { %v1142_v44 = vpop.permute.xlu0 %1141 }
0x1df3   :  { %1904 = vmatmul.mubr.msk.bf16.vlgmr.msra.gmra.mxu1 %vm92_vm1, %v1142_v44 }
0x1df4   :  { %1916 = vmatpush3.bf16.msra.mxu1 %v2364_v18  ;;  %1919 = vmatprep.mubr.msk.bf16.mxu1 %vm2111_vm0, %v2110_v1 }
0x1df5   :  { %1917 = vmatprep.subr.bf16.mxu1 %v2110_v1 }
0x1df8   :  { %1918 = vmatpush3.bf16.msra.mxu1 %v2382_v21 }
0x1df9   :  { %1931 = vmatprep.subr.bf16.mxu1 %v2110_v1 }
0x1eb3   :  { %v1180_v45 = vpop.f32.mrf.mxu1 }
0x1eb4   :  { %v1187_v46 = vrot.slane %v1180_v45, 2 }
0x1eb5   :  { %v1905_v47 = vpop.f32.mrf.mxu1 }
0x1eb6   :  { %v1189_v48 = vadd.f32 %v1187_v46, %v2419_v35 }
0x1eb7   :  { %v1183_v49 = vpop.f32.mrf.mxu1 }
0x1eb8   :  { %2051 = vtanh.f32 %v1189_v48  ;;  %v1722_v52 = vmul.f32 -1.442695, %v1189_v48 }
0x1eb9   :  { %v1906_v50 = vpop.f32.mrf.mxu1 }
0x1eba   :  { %2053 = vpow2.f32 %v1722_v52 }
0x1ec5   :  { %v2052_v51 = vpop.eup %2051 }
0x1ec6   :  { %1202 = vrot.lane.b32.xlu1 %v2052_v51, %s2113_s28 }
0x1ec7   :  { %v2054_v54 = vpop.eup %2053 }
0x1ec8   :  { %v1193_v56 = vadd.f32 1.0, %v2054_v54 }
0x1eca   :  { %2055 = vrcp.f32 %v1193_v56 }
0x1ed7   :  { %v2056_v57 = vpop.eup %2055 }
0x1ed8   :  { %v1200_v61 = vmul.f32 %v2056_v57, %v1198_v60 }
0x1f38   :  { %v1203_v58 = vpop.permute.xlu1 %1202 }
0x1f39   :  { %v1205_v59 = vmul.f32 %v2056_v57, %v1203_v58 }
0x1f3b   :  { %1207 = vrot.lane.b32.xlu0 %v1205_v59, %s2113_s28 }
0x1fad   :  { %v1208_v62 = vpop.permute.xlu0 %1207 }
0x1fae   :  { %v1210_v35 = vadd.f32 %v1208_v62, %v1200_v61 }
0x1fb0   :  { %2057 = vtanh.f32 %v1210_v35  ;;  %v1279_v43 = vrot.slane %v1210_v35, 6 }
0x1fbd   :  { %v2058_v63 = vpop.eup %2057 }
0x1fbe   :  { %1213 = vrot.lane.b32.xlu1 %v2058_v63, %s2113_s28 }
0x2030   :  { %v1214_v0 = vpop.permute.xlu1 %1213 }
0x2031   :  { %v2475_v3 = vmul.f32 %v2056_v57, %v1214_v0 }
0x2033   :  { %v1222_v6 = vpack.c.bf16 %v2475_v3, %v2475_v3 }
0x2035   :  { %v1224_v7 = vrot.slane %v1222_v6, 3 }
0x2037   :  { %1225 = vrot.lane.b32.xlu0 %v1224_v7, %s2114_s3 }
0x20a9   :  { %v1226_v9 = vpop.permute.xlu0 %1225 }
0x20aa   :  { %1912 = vmatmul.mubr.msk.bf16.vlgmr.msra.gmra.mxu0 %vm92_vm1, %v1226_v9 }
0x20ab   :  { %1924 = vmatpush3.bf16.msra.mxu0 %v2364_v18  ;;  %1927 = vmatprep.mubr.msk.bf16.mxu0 %vm2111_vm0, %v2110_v1 }
0x20ac   :  { %1925 = vmatprep.subr.bf16.mxu0 %v2110_v1 }
0x20af   :  { %1926 = vmatpush3.bf16.msra.mxu0 %v2382_v21 }
0x20b0   :  { %1939 = vmatprep.subr.bf16.mxu0 %v2110_v1 }
0x216a   :  { %v1264_v10 = vpop.f32.mrf.mxu0 }
0x216b   :  { %v1270_v12 = vadd.f32 %v1264_v10, %v2422_v39 }
0x216c   :  { %v1913_v17 = vpop.f32.mrf.mxu0 }
0x216d   :  { %2059 = vtanh.f32 %v1270_v12  ;;  %v1724_v16 = vmul.f32 -1.442695, %v1270_v12 }
0x216e   :  { %v1267_v13 = vpop.f32.mrf.mxu0 }
0x216f   :  { %2061 = vpow2.f32 %v1724_v16 }
0x2170   :  { %v1914_v14 = vpop.f32.mrf.mxu0 }
0x217a   :  { %v2060_v15 = vpop.eup %2059 }
0x217b   :  { %1283 = vrot.lane.b32.xlu1 %v2060_v15, %s2113_s28 }
0x217c   :  { %v2062_v33 = vpop.eup %2061 }
0x217d   :  { %v1274_v20 = vadd.f32 1.0, %v2062_v33 }
0x217f   :  { %2063 = vrcp.f32 %v1274_v20 }
0x218c   :  { %v2064_v5 = vpop.eup %2063 }
0x218d   :  { %v1281_v4 = vmul.f32 %v2064_v5, %v1279_v43 }
0x21ed   :  { %v1284_v19 = vpop.permute.xlu1 %1283 }
0x21ee   :  { %v1286_v55 = vmul.f32 %v2064_v5, %v1284_v19 }
0x21f0   :  { %1288 = vrot.lane.b32.xlu0 %v1286_v55, %s2113_s28 }
0x2262   :  { %v1289_v8 = vpop.permute.xlu0 %1288 }
0x2263   :  { %v1291_v22 = vadd.f32 %v1289_v8, %v1281_v4 }
0x2265   :  { %2065 = vtanh.f32 %v1291_v22 }
0x2272   :  { %v2066_v23 = vpop.eup %2065 }
0x2273   :  { %1294 = vrot.lane.b32.xlu1 %v2066_v23, %s2113_s28 }
0x22e5   :  { %v1295_v24 = vpop.permute.xlu1 %1294 }
0x22e6   :  { %v2491_v27 = vmul.f32 %v2064_v5, %v1295_v24 }
0x22e8   :  { %v1303_v28 = vpack.c.bf16 %v2491_v27, %v2491_v27 }
0x22ea   :  { %1305 = vrot.lane.b32.xlu0 %v1303_v28, %s2114_s3 }
0x235c   :  { %v1306_v29 = vpop.permute.xlu0 %1305 }
0x235d   :  { %1920 = vmatmul.mubr.msk.bf16.vlgmr.msra.gmra.mxu1 %vm92_vm1, %v1306_v29 }
0x235e   :  { %1932 = vmatpush3.bf16.msra.mxu1 %v2364_v18  ;;  %1935 = vmatprep.mubr.msk.bf16.mxu1 %vm2111_vm0, %v2110_v1 }
0x235f   :  { %1933 = vmatprep.subr.bf16.mxu1 %v2110_v1 }
0x2362   :  { %1934 = vmatpush3.bf16.msra.mxu1 %v2382_v21  ;;  %v1362_v21 = vrot.slane %v1291_v22, 6 }
0x241d   :  { %v1344_v30 = vpop.f32.mrf.mxu1 }
0x241e   :  { %v1351_v31 = vrot.slane %v1344_v30, 6 }
0x241f   :  { %v1921_v32 = vpop.f32.mrf.mxu1 }
0x2420   :  { %v1353_v34 = vadd.f32 %v1351_v31, %v2422_v39 }
0x2421   :  { %v1347_v36 = vpop.f32.mrf.mxu1 }
0x2422   :  { %2067 = vtanh.f32 %v1353_v34  ;;  %v1726_v40 = vmul.f32 -1.442695, %v1353_v34 }
0x2423   :  { %v1922_v37 = vpop.f32.mrf.mxu1 }
0x2424   :  { %2069 = vpow2.f32 %v1726_v40 }
0x242f   :  { %v2068_v38 = vpop.eup %2067 }
0x2430   :  { %1366 = vrot.lane.b32.xlu1 %v2068_v38, %s2113_s28 }
0x2431   :  { %v2070_v18 = vpop.eup %2069 }
0x2432   :  { %v1357_v41 = vadd.f32 1.0, %v2070_v18 }
0x2434   :  { %2071 = vrcp.f32 %v1357_v41 }
0x2441   :  { %v2072_v42 = vpop.eup %2071 }
0x2442   :  { %v1364_v46 = vmul.f32 %v2072_v42, %v1362_v21 }
0x24a2   :  { %v1367_v44 = vpop.permute.xlu1 %1366 }
0x24a3   :  { %v1369_v45 = vmul.f32 %v2072_v42, %v1367_v44 }
0x24a5   :  { %1371 = vrot.lane.b32.xlu0 %v1369_v45, %s2113_s28 }
0x2517   :  { %v1372_v47 = vpop.permute.xlu0 %1371 }
0x2518   :  { %v1374_v48 = vadd.f32 %v1372_v47, %v1364_v46  ;;  %v812_v46 = vstv %s811_s23  ;;  %v1557_v47 = vstv %s1731_s24 }
0x251a   :  { %2073 = vtanh.f32 %v1374_v48  ;;  %v1446_v12 = vrot.slane %v1374_v48, 6 }
0x2527   :  { %v2074_v49 = vpop.eup %2073 }
0x2528   :  { %1377 = vrot.lane.b32.xlu1 %v2074_v49, %s2113_s28 }
0x259a   :  { %v1378_v50 = vpop.permute.xlu1 %1377 }
0x259b   :  { %v2506_v51 = vmul.f32 %v2072_v42, %v1378_v50  ;;  %v1962_v42 = vld [vmem:[%s2588_s9] sm:$0xff]   ;;  %v1563_v50 = vstv %s2587_s8 }
0x259d   :  { %v1386_v52 = vpack.c.bf16 %v2506_v51, %v2506_v51 }
0x259f   :  { %v1388_v54 = vrot.slane %v1386_v52, 1 }
0x25a1   :  { %1389 = vrot.lane.b32.xlu0 %v1388_v54, %s2114_s3 }
0x2613   :  { %v1390_v56 = vpop.permute.xlu0 %1389 }
0x2614   :  { %1928 = vmatmul.mubr.msk.bf16.vlgmr.msra.gmra.mxu0 %vm92_vm1, %v1390_v56 }
0x2615   :  { %1943 = vmatprep.mubr.msk.bf16.mxu0 %vm2111_vm0, %v2110_v1 }
0x26d4   :  { %v1428_v57 = vpop.f32.mrf.mxu0 }
0x26d5   :  { %v1435_v58 = vrot.slane %v1428_v57, 4 }
0x26d6   :  { %v1929_v59 = vpop.f32.mrf.mxu0 }
0x26d7   :  { %v1437_v60 = vadd.f32 %v1435_v58, %v2422_v39 }
0x26d8   :  { %v1431_v61 = vpop.f32.mrf.mxu0 }
0x26d9   :  { %2075 = vtanh.f32 %v1437_v60  ;;  %v1728_v63 = vmul.f32 -1.442695, %v1437_v60 }
0x26da   :  { %v1930_v62 = vpop.f32.mrf.mxu0 }
0x26db   :  { %2077 = vpow2.f32 %v1728_v63 }
0x26e6   :  { %v2076_v35 = vpop.eup %2075 }
0x26e7   :  { %1450 = vrot.lane.b32.xlu1 %v2076_v35, %s2113_s28 }
0x26e8   :  { %v2078_v0 = vpop.eup %2077 }
0x26e9   :  { %v1441_v6 = vadd.f32 1.0, %v2078_v0 }
0x26eb   :  { %2079 = vrcp.f32 %v1441_v6 }
0x26f8   :  { %v2080_v7 = vpop.eup %2079 }
0x26f9   :  { %v1448_v17 = vmul.f32 %v2080_v7, %v1446_v12 }
0x2759   :  { %v1451_v9 = vpop.permute.xlu1 %1450 }
0x275a   :  { %v1453_v10 = vmul.f32 %v2080_v7, %v1451_v9 }
0x275c   :  { %1455 = vrot.lane.b32.xlu0 %v1453_v10, %s2113_s28 }
0x27ce   :  { %v1456_v13 = vpop.permute.xlu0 %1455 }
0x27cf   :  { %v1458_v14 = vadd.f32 %v1456_v13, %v1448_v17 }
0x27d1   :  { %2081 = vtanh.f32 %v1458_v14 }
0x27de   :  { %v2082_v15 = vpop.eup %2081 }
0x27df   :  { %1461 = vrot.lane.b32.xlu1 %v2082_v15, %s2113_s28 }
0x2851   :  { %v1462_v16 = vpop.permute.xlu1 %1461 }
0x2852   :  { %v1464_v33 = vmul.f32 %v2080_v7, %v1462_v16 }
0x2854   :  { %v1470_v20 = vpack.c.bf16 %v1464_v33, %v1464_v33 }
0x2856   :  { %v1472_v5 = vrot.slane %v1470_v20, 2  ;;  %v1736_v20 = vld [vmem:[%s2590_s11] ss:$0 sm:$0xff] }
0x2858   :  { %1473 = vrot.lane.b32.xlu0 %v1472_v5, %s2114_s3 }
0x28ca   :  { %v1474_v19 = vpop.permute.xlu0 %1473 }
0x28cb   :  { %1936 = vmatmul.mubr.msk.bf16.vlgmr.msra.gmra.mxu1 %vm92_vm1, %v1474_v19 }
0x298b   :  { %v1512_v55 = vpop.f32.mrf.mxu1 }
0x298c   :  { %v1519_v43 = vrot.slane %v1512_v55, 2 }
0x298d   :  { %v1937_v4 = vpop.f32.mrf.mxu1 }
0x298e   :  { %v1521_v8 = vadd.f32 %v1519_v43, %v2422_v39  ;;  %v1530_v39 = vrot.slane %v1458_v14, 6 }
0x298f   :  { %v1515_v22 = vpop.f32.mrf.mxu1 }
0x2990   :  { %2083 = vtanh.f32 %v1521_v8  ;;  %v1730_v28 = vmul.f32 -1.442695, %v1521_v8  ;;  %v1670_v8 = vstv %s2591_s12 }
0x2991   :  { %v1938_v23 = vpop.f32.mrf.mxu1 }
0x2992   :  { %2085 = vpow2.f32 %v1730_v28 }
0x299d   :  { %v2084_v24 = vpop.eup %2083 }
0x299e   :  { %1534 = vrot.lane.b32.xlu1 %v2084_v24, %s2113_s28 }
0x299f   :  { %v2086_v29 = vpop.eup %2085 }
0x29a0   :  { %v1525_v30 = vadd.f32 1.0, %v2086_v29 }
0x29a2   :  { %2087 = vrcp.f32 %v1525_v30 }
0x29af   :  { %v2088_v31 = vpop.eup %2087 }
0x29b0   :  { %v1532_v36 = vmul.f32 %v2088_v31, %v1530_v39 }
0x2a10   :  { %v1535_v32 = vpop.permute.xlu1 %1534 }
0x2a11   :  { %v1537_v34 = vmul.f32 %v2088_v31, %v1535_v32 }
0x2a13   :  { %1539 = vrot.lane.b32.xlu0 %v1537_v34, %s2113_s28 }
0x2a17   :  { %967 = vrot.lane.b32.xlu0 %v2427_v53, %s2114_s3 }
0x2a1b   :  { %1134 = vrot.lane.b32.xlu0 %v2459_v11, %s2114_s3 }
0x2a1f   :  { %1299 = vrot.lane.b32.xlu0 %v2491_v27, %s2114_s3  ;;  %v1961_v27 = vld [vmem:[%s2588_s9 + $0x8] sm:$0xff]  }
0x2a20   :  { %1940 = vmatpush3.bf16.msra.mxu0 %v1961_v27 }
0x2a21   :  { %1941 = vmatprep.subr.bf16.mxu0 %v2110_v1  ;;  %v813_v1 = vmul.f32 %v812_v46, %v2403_v25  ;;  %v814_v25 = vmul.f32 %v812_v46, %v2405_v26  ;;  %v1732_v26 = vld [vmem:[%s2589_s10] ss:$0 sm:$0xff] }
0x2a23   :  { %1466 = vrot.lane.b32.xlu0 %v1464_v33, %s2114_s3 }
0x2a24   :  { %1942 = vmatpush3.bf16.msra.mxu0 %v1962_v42 }
0x2a85   :  { %v1540_v37 = vpop.permute.xlu0 %1539 }
0x2a86   :  { %v1542_v38 = vadd.f32 %v1540_v37, %v1532_v36 }
0x2a88   :  { %2089 = vtanh.f32 %v1542_v38 }
0x2a89   :  { %v968_v40 = vpop.permute.xlu0 %967 }
0x2a8a   :  { %970 = vst.msk [vmem:[#allocation2] sm:$0x3] %vm221_vm2, %v968_v40 }
0x2a8d   :  { %v1135_v18 = vpop.permute.xlu0 %1134 }
0x2a8e   :  { %1137 = vst.msk [vmem:[#allocation2] sm:$0x30] %vm390_vm3, %v1135_v18 }
0x2a91   :  { %v1300_v53 = vpop.permute.xlu0 %1299 }
0x2a92   :  { %1302 = vst.msk [vmem:[#allocation2 + $0x8] sm:$0x3] %vm221_vm2, %v1300_v53 }
0x2a95   :  { %v2090_v11 = vpop.eup %2089  ;;  %v1467_v41 = vpop.permute.xlu0 %1466 }
0x2a96   :  { %1469 = vst.msk [vmem:[#allocation2 + $0x8] sm:$0x30] %vm390_vm3, %v1467_v41  ;;  %1545 = vrot.lane.b32.xlu1 %v2090_v11, %s2113_s28 }
0x2a9a   :  { %1050 = vrot.lane.b32.xlu1 %v2443_v2, %s2114_s3 }
0x2a9e   :  { %1218 = vrot.lane.b32.xlu1 %v2475_v3, %s2114_s3 }
0x2aa2   :  { %1382 = vrot.lane.b32.xlu1 %v2506_v51, %s2114_s3 }
0x2b08   :  { %v1546_v44 = vpop.permute.xlu1 %1545 }
0x2b09   :  { %v1548_v2 = vmul.f32 %v2088_v31, %v1546_v44 }
0x2b0b   :  { %1550 = vrot.lane.b32.xlu1 %v1548_v2, %s2114_s3 }
0x2b0c   :  { %v1051_v3 = vpop.permute.xlu1 %1050 }
0x2b0d   :  { %1053 = vst.msk [vmem:[#allocation2] sm:$0xc] %vm305_vm4, %v1051_v3 }
0x2b10   :  { %v1219_v45 = vpop.permute.xlu1 %1218 }
0x2b11   :  { %1221 = vst.msk [vmem:[#allocation2] sm:$0xc0] %vm475_vm5, %v1219_v45 }
0x2b14   :  { %v1383_v21 = vpop.permute.xlu1 %1382 }
0x2b15   :  { %1385 = vst.msk [vmem:[#allocation2 + $0x8] sm:$0xc] %vm305_vm4, %v1383_v21 }
0x2b18   :  { %v1554_v48 = vld [vmem:[#allocation2] sm:$0xff] }
0x2b19   :  { %v1558_v49 = vmul.f32 %v1557_v47, %v1554_v48 }
0x2b1b   :  { %v1560_v51 = vadd.f32 %v1558_v49, %v813_v1 }
0x2b1d   :  { %v1564_v52 = vadd.f32 %v1563_v50, %v1560_v51 }
0x2b1f   :  { %1566 = vst.msk [vmem:[%s2592_s13] sm:$0xff] %vm92_vm1, %v1564_v52  ;;  %v1569_v56 = vrot.slane %v1564_v52, 2  ;;  %v1572_v58 = vrot.slane %v1564_v52, 4  ;;  %v1575_v35 = vrot.slane %v1564_v52, 6 }
0x2b21   :  { %v1571_v57 = vmax.f32 %v1564_v52, %v1569_v56 }
0x2b23   :  { %v1574_v61 = vmax.f32 %v1571_v57, %v1572_v58 }
0x2b25   :  { %v1577_v0 = vmax.f32 %v1574_v61, %v1575_v35 }
0x2b7d   :  { %v1551_v54 = vpop.permute.xlu1 %1550 }
0x2b7e   :  { %1553 = vst.msk [vmem:[#allocation2 + $0x8] sm:$0xc0] %vm475_vm5, %v1551_v54 }
0x2b85   :  { %v1555_v59 = vld [vmem:[#allocation2 + $0x8] sm:$0xff] }
0x2b86   :  { %v1559_v60 = vmul.f32 %v1557_v47, %v1555_v59 }
0x2b88   :  { %v1561_v62 = vadd.f32 %v1559_v60, %v814_v25 }
0x2b8a   :  { %v1565_v63 = vadd.f32 %v1563_v50, %v1561_v62 }
0x2b8c   :  { %1567 = vst.msk [vmem:[%s2592_s13 + $0x8] sm:$0xff] %vm92_vm1, %v1565_v63  ;;  %v1578_v6 = vmax.f32 %v1577_v0, %v1565_v63  ;;  %v1580_v7 = vrot.slane %v1565_v63, 2  ;;  %v1583_v10 = vrot.slane %v1565_v63, 4  ;;  %v1586_v17 = vrot.slane %v1565_v63, 6 }
0x2b8e   :  { %v1582_v9 = vmax.f32 %v1578_v6, %v1580_v7 }
0x2b90   :  { %v1585_v12 = vmax.f32 %v1582_v9, %v1583_v10 }
0x2b92   :  { %v1588_v13 = vmax.f32 %v1585_v12, %v1586_v17 }
0x2b94   :  { %v1589_v14 = vpack.c.bf16 %v1588_v13, %v1588_v13 }
0x2b96   :  { %1944 = vmatmul.mubr.msk.bf16.vlgmr.msra.gmra.mxu0 %vm92_vm1, %v1589_v14 }
0x2c56   :  { %v1650_v15 = vpop.f32.mrf.mxu0 }
0x2c57   :  { %v1651_v16 = vadd.f32 %v1732_v26, %v1650_v15 }
0x2c58   :  { %v1945_v33 = vpop.f32.mrf.mxu0 }
0x2c59   :  { %v1656_v5 = vmax.f32 %v1651_v16, 0.0 }
0x2c5a   :  { %v1653_v19 = vpop.f32.mrf.mxu0 }
0x2c5b   :  { %v1664_v55 = vmul.f32 %v1736_v20, %v1656_v5 }
0x2c5c   :  { %v1946_v43 = vpop.f32.mrf.mxu0 }
0x2c5d   :  { %v1666_v4 = vsel %vm1665_vm6, %v1664_v55, 0.0 }
0x2c5e   :  { %1667 = vadd.xlane.f32.xlu0 %v1666_v4 }
0x2ce7   :  { %v1668_v22 = vpop.xlane.xlu0 %1667 }
0x2ce8   :  { %v1671_v23 = vadd.f32 %v1670_v8, %v1668_v22 }
0x2cea   :  { %v1737_v24 = vmul.f32 -1.442695, %v1671_v23 }
0x2cec   :  { %2091 = vpow2.f32 %v1737_v24 }
0x2cf9   :  { %v2092_v28 = vpop.eup %2091 }
0x2cfa   :  { %v1675_v29 = vadd.f32 1.0, %v2092_v28 }
0x2cfc   :  { %2093 = vrcp.f32 %v1675_v29 }
0x2d09   :  { %v2094_v30 = vpop.eup %2093 }
0x2d0a   :  { %1679 = vst.msk [vmem:[%s2593_s14] sm:$0x3] %vm1678_vm7, %v2094_v30 }
0x2d0b   :  { %1688 = vsyncpa [#allocation6], 1 }

</bundles_post_ra>
